<compile_context>
chip_gen: v5e
topology: v5e:2x2
jax: 0.10.0
libtpu: 0.0.40
codegen_flags: <defaults>
</compile_context>

<pallas_src>
import functools
import math

import jax
import jax.numpy as jnp
from jax import lax
from jax.experimental import pallas as pl
from jax.experimental.pallas import tpu as pltpu


# ----------------------------- Fused Pallas kernel -----------------------------

def _bert_fused_kernel(
    emb_ref, maskb_ref, eg_ref, ebt_ref,
    qkvw_ref, qkvb_ref, aow_ref, aob_ref, alg_ref, alb_ref,
    f1w_ref, f1b_ref, f2w_ref, f2b_ref, flg_ref, flb_ref,
    pw_ref, pb_ref, cw_ref, cb_ref,
    out_ref,
    ctx_ref,
    *, num_layers, num_heads, batch, seq, eps):
    H = emb_ref.shape[-1]
    dH = H // num_heads
    BS = batch * seq

    def layernorm(x, g, b):
        mu = jnp.mean(x, axis=-1, keepdims=True)
        var = jnp.mean(jnp.square(x - mu), axis=-1, keepdims=True)
        return (x - mu) * lax.rsqrt(var + eps) * g + b

    def matmul(a, w):
        # MXU inputs in bf16 (weights are packed bf16), f32 accumulation.
        return jnp.dot(a.astype(w.dtype), w, preferred_element_type=jnp.float32)

    # [B, S, S] additive mask bias; loaded once, reused by every layer/head
    # (no broadcast_in_dim anywhere in the unrolled trace).
    mask_bias = maskb_ref[...]

    # Embedding LayerNorm (no residual, no zeros array).
    hidden = layernorm(emb_ref[...], eg_ref[...], ebt_ref[...])          # [B*S, H] f32

    for l in range(num_layers):                                          # static unroll (toy L)
        x = hidden

        # Fused QKV projection: [B*S, 3H]; Q weights/bias pre-scaled by 1/sqrt(dH).
        qkv = matmul(x, qkvw_ref[l]) + qkvb_ref[l]                       # f32

        # Attention: per head, batched over the batch dim with 3-D einsums.
        # Head contexts are stored into VMEM scratch at static lane offsets.
        for h in range(num_heads):
            q3 = qkv[:, h * dH:(h + 1) * dH].reshape(batch, seq, dH)
            k3 = qkv[:, H + h * dH:H + (h + 1) * dH].reshape(batch, seq, dH)
            v3 = qkv[:, 2 * H + h * dH:2 * H + (h + 1) * dH].reshape(batch, seq, dH)
            s = jnp.einsum('bqd,bkd->bqk',
                           q3.astype(jnp.bfloat16), k3.astype(jnp.bfloat16),
                           preferred_element_type=jnp.float32)           # [B, S, S] f32
            s = s + mask_bias
            s = s - jnp.max(s, axis=-1, keepdims=True)
            p = jnp.exp(s)
            p = p * pl.reciprocal(jnp.sum(p, axis=-1, keepdims=True), approx=False)
            ctx_h = jnp.einsum('bqk,bkd->bqd',
                               p.astype(jnp.bfloat16), v3.astype(jnp.bfloat16),
                               preferred_element_type=jnp.float32)       # [B, S, dH] f32
            ctx_ref[:, h * dH:(h + 1) * dH] = ctx_h.reshape(BS, dH)

        # Attention output projection + residual + LayerNorm (fused epilogue).
        attn_out = matmul(ctx_ref[...], aow_ref[l]) + aob_ref[l]
        hidden = layernorm(attn_out + x, alg_ref[l], alb_ref[l])

        # FFN: dense + exact erf-GELU (f32), dense, residual + LayerNorm.
        ff = matmul(hidden, f1w_ref[l]) + f1b_ref[l]
        ff = 0.5 * ff * (1.0 + lax.erf(ff * (1.0 / math.sqrt(2.0))))
        ff = matmul(ff, f2w_ref[l]) + f2b_ref[l]
        hidden = layernorm(ff + hidden, flg_ref[l], flb_ref[l])

    # Pooler over CLS rows (row 0 of every sequence): leading-dim reshape + sublane
    # slice, no Python-list concatenate.
    cls = hidden.reshape(batch, seq, H)[:, 0, :]                         # [B, H]
    pooled = jnp.tanh(matmul(cls, pw_ref[...]) + pb_ref[...])
    # TODO(synk): nn.Dropout(0.3) is identity at inference; training-mode dropout omitted.
    # Output last dim (num_classes) < 128 -> masked partial store; trivial at this size.
    out_ref[...] = matmul(pooled, cw_ref[...]) + cb_ref[...]             # [B, num_classes]


# ----------------------------- Parameters -----------------------------

CFG = dict(vocab_size=100, hidden=32, num_heads=2, num_layers=2,
           intermediate=64, max_pos=16, type_vocab=2, num_classes=3)


def init_params(key, cfg):
    H, I = cfg["hidden"], cfg["intermediate"]
    keys = iter(jax.random.split(key, 128))

    def norm(shape, scale=0.02):
        return scale * jax.random.normal(next(keys), shape, dtype=jnp.float32)

    p = {
        "word_emb": norm((cfg["vocab_size"], H)),
        "pos_emb": norm((cfg["max_pos"], H)),
        "type_emb": norm((cfg["type_vocab"], H)),
        "emb_ln_g": jnp.ones((H,), jnp.float32),
        "emb_ln_b": jnp.zeros((H,), jnp.float32),
        "layers": [],
        "pool_w": norm((H, H)),
        "pool_b": jnp.zeros((H,), jnp.float32),
        "cls_w": norm((H, cfg["num_classes"])),
        "cls_b": jnp.zeros((cfg["num_classes"],), jnp.float32),
    }
    for _ in range(cfg["num_layers"]):
        p["layers"].append({
            "q_w": norm((H, H)), "q_b": jnp.zeros((H,), jnp.float32),
            "k_w": norm((H, H)), "k_b": jnp.zeros((H,), jnp.float32),
            "v_w": norm((H, H)), "v_b": jnp.zeros((H,), jnp.float32),
            "ao_w": norm((H, H)), "ao_b": jnp.zeros((H,), jnp.float32),
            "attn_ln_g": jnp.ones((H,), jnp.float32),
            "attn_ln_b": jnp.zeros((H,), jnp.float32),
            "ff1_w": norm((H, I)), "ff1_b": jnp.zeros((I,), jnp.float32),
            "ff2_w": norm((I, H)), "ff2_b": jnp.zeros((H,), jnp.float32),
            "ffn_ln_g": jnp.ones((H,), jnp.float32),
            "ffn_ln_b": jnp.zeros((H,), jnp.float32),
        })
    return p


def pack_params(params, cfg):
    """Stack per-layer weights into [L,...] arrays, fuse QKV, fold 1/sqrt(dH) into Q,
    and cast all matmul weights to bf16 (biases / LN params stay f32)."""
    H, I, C = cfg["hidden"], cfg["intermediate"], cfg["num_classes"]
    dH = H // cfg["num_heads"]
    scale = 1.0 / math.sqrt(dH)
    bf16 = jnp.bfloat16

    def stack(fn, dtype=None):
        a = jnp.stack([fn(l) for l in params["layers"]], axis=0)
        return a.astype(dtype) if dtype is not None else a

    return {
        "word_emb": params["word_emb"],
        "pos_emb": params["pos_emb"],
        "type_emb": params["type_emb"],
        "emb_ln_g": params["emb_ln_g"].reshape(1, H),
        "emb_ln_b": params["emb_ln_b"].reshape(1, H),
        # [L, H, 3H] bf16 / [L, 1, 3H] f32; Q part pre-scaled (kernel skips score scale).
        "qkv_w": stack(lambda l: jnp.concatenate(
            [l["q_w"] * scale, l["k_w"], l["v_w"]], axis=1), bf16),
        "qkv_b": stack(lambda l: jnp.concatenate(
            [l["q_b"] * scale, l["k_b"], l["v_b"]], axis=0).reshape(1, 3 * H)),
        "ao_w": stack(lambda l: l["ao_w"], bf16),
        "ao_b": stack(lambda l: l["ao_b"].reshape(1, H)),
        "attn_ln_g": stack(lambda l: l["attn_ln_g"].reshape(1, H)),
        "attn_ln_b": stack(lambda l: l["attn_ln_b"].reshape(1, H)),
        "ff1_w": stack(lambda l: l["ff1_w"], bf16),
        "ff1_b": stack(lambda l: l["ff1_b"].reshape(1, I)),
        "ff2_w": stack(lambda l: l["ff2_w"], bf16),
        "ff2_b": stack(lambda l: l["ff2_b"].reshape(1, H)),
        "ffn_ln_g": stack(lambda l: l["ffn_ln_g"].reshape(1, H)),
        "ffn_ln_b": stack(lambda l: l["ffn_ln_b"].reshape(1, H)),
        "pool_w": params["pool_w"].astype(bf16),
        "pool_b": params["pool_b"].reshape(1, H),
        "cls_w": params["cls_w"].astype(bf16),
        "cls_b": params["cls_b"].reshape(1, C),
    }


# ----------------------------- Forward (glue + one fused kernel) -----------------------------

def bert_classifier_forward(packed, input_ids, attention_mask, cfg):
    B, S = input_ids.shape
    H = cfg["hidden"]

    # Embedding lookup (gather) stays in XLA glue at toy size.
    # TODO(synk): for real shapes, prefetch input_ids (PrefetchScalarGridSpec) and
    # gather embedding rows in-kernel to avoid the extra HBM round trip.
    word = jnp.take(packed["word_emb"], input_ids, axis=0)               # [B,S,H]
    pos = packed["pos_emb"][:S][None, :, :]                              # [1,S,H]
    typ = packed["type_emb"][0][None, None, :]                           # [1,1,H] (token_type_ids=0)
    emb = (word + pos + typ).reshape(B * S, H).astype(jnp.float32)

    # Full [B, S, S] additive mask bias, precomputed once (hoisted out of all
    # in-kernel layer/head loops).
    mask_bias = jnp.broadcast_to(
        ((1.0 - attention_mask.astype(jnp.float32)) * (-10000.0))[:, None, :],
        (B, S, S))

    kernel = functools.partial(
        _bert_fused_kernel,
        num_layers=cfg["num_layers"], num_heads=cfg["num_heads"],
        batch=B, seq=S, eps=1e-12)

    vmem_spec = pl.BlockSpec(memory_space=pltpu.MemorySpace.VMEM)        # whole array in VMEM
    num_inputs = 20

    return pl.pallas_call(
        kernel,
        out_shape=jax.ShapeDtypeStruct((B, cfg["num_classes"]), jnp.float32),
        in_specs=[vmem_spec] * num_inputs,
        out_specs=vmem_spec,
        scratch_shapes=[pltpu.VMEM((B * S, H), jnp.float32)],            # attention context buffer
    )(emb, mask_bias,
      packed["emb_ln_g"], packed["emb_ln_b"],
      packed["qkv_w"], packed["qkv_b"],
      packed["ao_w"], packed["ao_b"],
      packed["attn_ln_g"], packed["attn_ln_b"],
      packed["ff1_w"], packed["ff1_b"],
      packed["ff2_w"], packed["ff2_b"],
      packed["ffn_ln_g"], packed["ffn_ln_b"],
      packed["pool_w"], packed["pool_b"],
      packed["cls_w"], packed["cls_b"])


# ----------------------------- Main -----------------------------

if __name__ == "__main__":
    key = jax.random.PRNGKey(0)
    pkey, ikey = jax.random.split(key)

    params = init_params(pkey, CFG)
    packed = pack_params(params, CFG)        # one-time weight packing (outside jit)

    B, S = 2, 8
    input_ids = jax.random.randint(ikey, (B, S), 0, CFG["vocab_size"], dtype=jnp.int32)
    attention_mask = jnp.array([[1, 1, 1, 1, 1, 1, 1, 1],
                                [1, 1, 1, 1, 1, 0, 0, 0]], dtype=jnp.int32)

    fwd = jax.jit(functools.partial(bert_classifier_forward, cfg=CFG))
    logits = fwd(packed, input_ids, attention_mask)
    jax.block_until_ready(logits)
    assert logits.shape == (B, CFG["num_classes"])
    print("KERNEL_OK")
</pallas_src>

<mosaic_0001>
module attributes {stable_mosaic.version = 11 : i64} {
  func.func @_bert_fused_kernel(%arg0: memref<16x32xf32, #tpu.memory_space<vmem>>, %arg1: memref<2x8x8xf32, #tpu.memory_space<vmem>>, %arg2: memref<1x32xf32, #tpu.memory_space<vmem>>, %arg3: memref<1x32xf32, #tpu.memory_space<vmem>>, %arg4: memref<2x32x96xbf16, #tpu.memory_space<vmem>>, %arg5: memref<2x1x96xf32, #tpu.memory_space<vmem>>, %arg6: memref<2x32x32xbf16, #tpu.memory_space<vmem>>, %arg7: memref<2x1x32xf32, #tpu.memory_space<vmem>>, %arg8: memref<2x1x32xf32, #tpu.memory_space<vmem>>, %arg9: memref<2x1x32xf32, #tpu.memory_space<vmem>>, %arg10: memref<2x32x64xbf16, #tpu.memory_space<vmem>>, %arg11: memref<2x1x64xf32, #tpu.memory_space<vmem>>, %arg12: memref<2x64x32xbf16, #tpu.memory_space<vmem>>, %arg13: memref<2x1x32xf32, #tpu.memory_space<vmem>>, %arg14: memref<2x1x32xf32, #tpu.memory_space<vmem>>, %arg15: memref<2x1x32xf32, #tpu.memory_space<vmem>>, %arg16: memref<32x32xbf16, #tpu.memory_space<vmem>>, %arg17: memref<1x32xf32, #tpu.memory_space<vmem>>, %arg18: memref<32x3xbf16, #tpu.memory_space<vmem>>, %arg19: memref<1x3xf32, #tpu.memory_space<vmem>>, %arg20: memref<2x3xf32, #tpu.memory_space<vmem>>, %arg21: memref<16x32xf32, #tpu.memory_space<vmem>>) attributes {dimension_semantics = [], scalar_prefetch = 0 : i64, scratch_operands = 1 : i64, tpu.core_type = #tpu.core_type<tc>} {
    %c0 = arith.constant 0 : index
    %c0_0 = arith.constant 0 : index
    %c0_1 = arith.constant 0 : index
    %0 = vector.load %arg1[%c0, %c0_0, %c0_1] : memref<2x8x8xf32, #tpu.memory_space<vmem>>, vector<2x8x8xf32>
    %c0_2 = arith.constant 0 : index
    %c0_3 = arith.constant 0 : index
    %1 = vector.load %arg0[%c0_2, %c0_3] : memref<16x32xf32, #tpu.memory_space<vmem>>, vector<16x32xf32>
    %c0_4 = arith.constant 0 : index
    %c0_5 = arith.constant 0 : index
    %2 = vector.load %arg2[%c0_4, %c0_5] : memref<1x32xf32, #tpu.memory_space<vmem>>, vector<1x32xf32>
    %c0_6 = arith.constant 0 : index
    %c0_7 = arith.constant 0 : index
    %3 = vector.load %arg3[%c0_6, %c0_7] : memref<1x32xf32, #tpu.memory_space<vmem>>, vector<1x32xf32>
    %cst = arith.constant dense<0.000000e+00> : vector<16xf32>
    %4 = vector.multi_reduction <add>, %1, %cst [1] : vector<16x32xf32> to vector<16xf32>
    %5 = vector.shape_cast %4 : vector<16xf32> to vector<16x1xf32>
    %cst_8 = arith.constant 3.200000e+01 : f32
    %6 = vector.broadcast %cst_8 : f32 to vector<16x1xf32>
    %7 = arith.divf %5, %6 : vector<16x1xf32>
    %8 = vector.broadcast %7 : vector<16x1xf32> to vector<16x32xf32>
    %9 = arith.subf %1, %8 : vector<16x32xf32>
    %10 = arith.mulf %9, %9 : vector<16x32xf32>
    %cst_9 = arith.constant dense<0.000000e+00> : vector<16xf32>
    %11 = vector.multi_reduction <add>, %10, %cst_9 [1] : vector<16x32xf32> to vector<16xf32>
    %12 = vector.shape_cast %11 : vector<16xf32> to vector<16x1xf32>
    %cst_10 = arith.constant 3.200000e+01 : f32
    %13 = vector.broadcast %cst_10 : f32 to vector<16x1xf32>
    %14 = arith.divf %12, %13 : vector<16x1xf32>
    %15 = vector.broadcast %7 : vector<16x1xf32> to vector<16x32xf32>
    %16 = arith.subf %1, %15 : vector<16x32xf32>
    %cst_11 = arith.constant 9.99999996E-13 : f32
    %17 = vector.broadcast %cst_11 : f32 to vector<16x1xf32>
    %18 = arith.addf %14, %17 : vector<16x1xf32>
    %19 = math.rsqrt %18 : vector<16x1xf32>
    %20 = vector.broadcast %19 : vector<16x1xf32> to vector<16x32xf32>
    %21 = arith.mulf %16, %20 : vector<16x32xf32>
    %22 = vector.broadcast %2 : vector<1x32xf32> to vector<16x32xf32>
    %23 = arith.mulf %21, %22 : vector<16x32xf32>
    %24 = vector.broadcast %3 : vector<1x32xf32> to vector<16x32xf32>
    %25 = arith.addf %23, %24 : vector<16x32xf32>
    %c0_12 = arith.constant 0 : index
    %c0_13 = arith.constant 0 : index
    %c0_14 = arith.constant 0 : index
    %26 = vector.load %arg4[%c0_12, %c0_13, %c0_14] : memref<2x32x96xbf16, #tpu.memory_space<vmem>>, vector<1x32x96xbf16>
    %27 = vector.shape_cast %26 : vector<1x32x96xbf16> to vector<32x96xbf16>
    %28 = arith.truncf %25 : vector<16x32xf32> to vector<16x32xbf16>
    %cst_15 = arith.constant dense<0.000000e+00> : vector<16x96xf32>
    %29 = tpu.matmul %28, %27, %cst_15 {dimension_numbers = #tpu.dot_dimension_numbers<[1], [0], [0], [1], [0, 0, 1, 1], [], []>} : vector<16x32xbf16>, vector<32x96xbf16>, vector<16x96xf32> -> vector<16x96xf32>
    %c0_16 = arith.constant 0 : index
    %c0_17 = arith.constant 0 : index
    %c0_18 = arith.constant 0 : index
    %30 = vector.load %arg5[%c0_16, %c0_17, %c0_18] : memref<2x1x96xf32, #tpu.memory_space<vmem>>, vector<1x1x96xf32>
    %31 = vector.shape_cast %30 : vector<1x1x96xf32> to vector<1x96xf32>
    %32 = vector.broadcast %31 : vector<1x96xf32> to vector<16x96xf32>
    %33 = arith.addf %29, %32 : vector<16x96xf32>
    %34 = vector.extract_strided_slice %33 {offsets = [0, 0], sizes = [16, 16], strides = [1, 1]} : vector<16x96xf32> to vector<16x16xf32>
    %35 = vector.shape_cast %34 : vector<16x16xf32> to vector<2x8x16xf32>
    %36 = vector.extract_strided_slice %33 {offsets = [0, 32], sizes = [16, 16], strides = [1, 1]} : vector<16x96xf32> to vector<16x16xf32>
    %37 = vector.shape_cast %36 : vector<16x16xf32> to vector<2x8x16xf32>
    %38 = vector.extract_strided_slice %33 {offsets = [0, 64], sizes = [16, 16], strides = [1, 1]} : vector<16x96xf32> to vector<16x16xf32>
    %39 = vector.shape_cast %38 : vector<16x16xf32> to vector<2x8x16xf32>
    %40 = arith.truncf %35 : vector<2x8x16xf32> to vector<2x8x16xbf16>
    %41 = arith.truncf %37 : vector<2x8x16xf32> to vector<2x8x16xbf16>
    "tpu.trace_start"() <{level = 10 : i32, message = "bqd,bkd->bqk"}> : () -> ()
    %cst_19 = arith.constant dense<0.000000e+00> : vector<2x8x8xf32>
    %42 = tpu.matmul %40, %41, %cst_19 {dimension_numbers = #tpu.dot_dimension_numbers<[2], [2], [1], [1], [0, 0, 0, 1, 1, 1], [0], [0]>} : vector<2x8x16xbf16>, vector<2x8x16xbf16>, vector<2x8x8xf32> -> vector<2x8x8xf32>
    "tpu.trace_stop"() : () -> ()
    %43 = arith.addf %42, %0 : vector<2x8x8xf32>
    %cst_20 = arith.constant dense<0xFF800000> : vector<2x8xf32>
    %44 = vector.multi_reduction <maximumf>, %43, %cst_20 [2] : vector<2x8x8xf32> to vector<2x8xf32>
    %45 = vector.shape_cast %44 : vector<2x8xf32> to vector<2x8x1xf32>
    %46 = vector.broadcast %45 : vector<2x8x1xf32> to vector<2x8x8xf32>
    %47 = arith.subf %43, %46 : vector<2x8x8xf32>
    %48 = math.exp %47 : vector<2x8x8xf32>
    %cst_21 = arith.constant dense<0.000000e+00> : vector<2x8xf32>
    %49 = vector.multi_reduction <add>, %48, %cst_21 [2] : vector<2x8x8xf32> to vector<2x8xf32>
    %50 = vector.shape_cast %49 : vector<2x8xf32> to vector<2x8x1xf32>
    %51 = tpu.reciprocal %50 : vector<2x8x1xf32> -> vector<2x8x1xf32>
    %52 = vector.broadcast %51 : vector<2x8x1xf32> to vector<2x8x8xf32>
    %53 = arith.mulf %48, %52 : vector<2x8x8xf32>
    %54 = arith.truncf %53 : vector<2x8x8xf32> to vector<2x8x8xbf16>
    %55 = arith.truncf %39 : vector<2x8x16xf32> to vector<2x8x16xbf16>
    "tpu.trace_start"() <{level = 10 : i32, message = "bqk,bkd->bqd"}> : () -> ()
    %cst_22 = arith.constant dense<0.000000e+00> : vector<2x8x16xf32>
    %56 = tpu.matmul %54, %55, %cst_22 {dimension_numbers = #tpu.dot_dimension_numbers<[2], [1], [1], [2], [0, 0, 0, 1, 1, 2], [0], [0]>} : vector<2x8x8xbf16>, vector<2x8x16xbf16>, vector<2x8x16xf32> -> vector<2x8x16xf32>
    "tpu.trace_stop"() : () -> ()
    %57 = vector.shape_cast %56 : vector<2x8x16xf32> to vector<16x16xf32>
    %c0_23 = arith.constant 0 : index
    %c0_24 = arith.constant 0 : index
    %58 = vector.load %arg21[%c0_23, %c0_24] : memref<16x32xf32, #tpu.memory_space<vmem>>, vector<16x16xf32>
    tpu.vector_store %arg21[%c0_23, %c0_24], %57 {strides = array<i32>} : memref<16x32xf32, #tpu.memory_space<vmem>>, vector<16x16xf32>,
    %59 = vector.extract_strided_slice %33 {offsets = [0, 16], sizes = [16, 16], strides = [1, 1]} : vector<16x96xf32> to vector<16x16xf32>
    %60 = vector.shape_cast %59 : vector<16x16xf32> to vector<2x8x16xf32>
    %61 = vector.extract_strided_slice %33 {offsets = [0, 48], sizes = [16, 16], strides = [1, 1]} : vector<16x96xf32> to vector<16x16xf32>
    %62 = vector.shape_cast %61 : vector<16x16xf32> to vector<2x8x16xf32>
    %63 = vector.extract_strided_slice %33 {offsets = [0, 80], sizes = [16, 16], strides = [1, 1]} : vector<16x96xf32> to vector<16x16xf32>
    %64 = vector.shape_cast %63 : vector<16x16xf32> to vector<2x8x16xf32>
    %65 = arith.truncf %60 : vector<2x8x16xf32> to vector<2x8x16xbf16>
    %66 = arith.truncf %62 : vector<2x8x16xf32> to vector<2x8x16xbf16>
    "tpu.trace_start"() <{level = 10 : i32, message = "bqd,bkd->bqk"}> : () -> ()
    %cst_25 = arith.constant dense<0.000000e+00> : vector<2x8x8xf32>
    %67 = tpu.matmul %65, %66, %cst_25 {dimension_numbers = #tpu.dot_dimension_numbers<[2], [2], [1], [1], [0, 0, 0, 1, 1, 1], [0], [0]>} : vector<2x8x16xbf16>, vector<2x8x16xbf16>, vector<2x8x8xf32> -> vector<2x8x8xf32>
    "tpu.trace_stop"() : () -> ()
    %68 = arith.addf %67, %0 : vector<2x8x8xf32>
    %cst_26 = arith.constant dense<0xFF800000> : vector<2x8xf32>
    %69 = vector.multi_reduction <maximumf>, %68, %cst_26 [2] : vector<2x8x8xf32> to vector<2x8xf32>
    %70 = vector.shape_cast %69 : vector<2x8xf32> to vector<2x8x1xf32>
    %71 = vector.broadcast %70 : vector<2x8x1xf32> to vector<2x8x8xf32>
    %72 = arith.subf %68, %71 : vector<2x8x8xf32>
    %73 = math.exp %72 : vector<2x8x8xf32>
    %cst_27 = arith.constant dense<0.000000e+00> : vector<2x8xf32>
    %74 = vector.multi_reduction <add>, %73, %cst_27 [2] : vector<2x8x8xf32> to vector<2x8xf32>
    %75 = vector.shape_cast %74 : vector<2x8xf32> to vector<2x8x1xf32>
    %76 = tpu.reciprocal %75 : vector<2x8x1xf32> -> vector<2x8x1xf32>
    %77 = vector.broadcast %76 : vector<2x8x1xf32> to vector<2x8x8xf32>
    %78 = arith.mulf %73, %77 : vector<2x8x8xf32>
    %79 = arith.truncf %78 : vector<2x8x8xf32> to vector<2x8x8xbf16>
    %80 = arith.truncf %64 : vector<2x8x16xf32> to vector<2x8x16xbf16>
    "tpu.trace_start"() <{level = 10 : i32, message = "bqk,bkd->bqd"}> : () -> ()
    %cst_28 = arith.constant dense<0.000000e+00> : vector<2x8x16xf32>
    %81 = tpu.matmul %79, %80, %cst_28 {dimension_numbers = #tpu.dot_dimension_numbers<[2], [1], [1], [2], [0, 0, 0, 1, 1, 2], [0], [0]>} : vector<2x8x8xbf16>, vector<2x8x16xbf16>, vector<2x8x16xf32> -> vector<2x8x16xf32>
    "tpu.trace_stop"() : () -> ()
    %82 = vector.shape_cast %81 : vector<2x8x16xf32> to vector<16x16xf32>
    %c0_29 = arith.constant 0 : index
    %c16 = arith.constant 16 : index
    %83 = vector.load %arg21[%c0_29, %c16] : memref<16x32xf32, #tpu.memory_space<vmem>>, vector<16x16xf32>
    tpu.vector_store %arg21[%c0_29, %c16], %82 {strides = array<i32>} : memref<16x32xf32, #tpu.memory_space<vmem>>, vector<16x16xf32>,
    %c0_30 = arith.constant 0 : index
    %c0_31 = arith.constant 0 : index
    %84 = vector.load %arg21[%c0_30, %c0_31] : memref<16x32xf32, #tpu.memory_space<vmem>>, vector<16x32xf32>
    %c0_32 = arith.constant 0 : index
    %c0_33 = arith.constant 0 : index
    %c0_34 = arith.constant 0 : index
    %85 = vector.load %arg6[%c0_32, %c0_33, %c0_34] : memref<2x32x32xbf16, #tpu.memory_space<vmem>>, vector<1x32x32xbf16>
    %86 = vector.shape_cast %85 : vector<1x32x32xbf16> to vector<32x32xbf16>
    %87 = arith.truncf %84 : vector<16x32xf32> to vector<16x32xbf16>
    %cst_35 = arith.constant dense<0.000000e+00> : vector<16x32xf32>
    %88 = tpu.matmul %87, %86, %cst_35 {dimension_numbers = #tpu.dot_dimension_numbers<[1], [0], [0], [1], [0, 0, 1, 1], [], []>} : vector<16x32xbf16>, vector<32x32xbf16>, vector<16x32xf32> -> vector<16x32xf32>
    %c0_36 = arith.constant 0 : index
    %c0_37 = arith.constant 0 : index
    %c0_38 = arith.constant 0 : index
    %89 = vector.load %arg7[%c0_36, %c0_37, %c0_38] : memref<2x1x32xf32, #tpu.memory_space<vmem>>, vector<1x1x32xf32>
    %90 = vector.shape_cast %89 : vector<1x1x32xf32> to vector<1x32xf32>
    %91 = vector.broadcast %90 : vector<1x32xf32> to vector<16x32xf32>
    %92 = arith.addf %88, %91 : vector<16x32xf32>
    %93 = arith.addf %92, %25 : vector<16x32xf32>
    %c0_39 = arith.constant 0 : index
    %c0_40 = arith.constant 0 : index
    %c0_41 = arith.constant 0 : index
    %94 = vector.load %arg8[%c0_39, %c0_40, %c0_41] : memref<2x1x32xf32, #tpu.memory_space<vmem>>, vector<1x1x32xf32>
    %95 = vector.shape_cast %94 : vector<1x1x32xf32> to vector<1x32xf32>
    %c0_42 = arith.constant 0 : index
    %c0_43 = arith.constant 0 : index
    %c0_44 = arith.constant 0 : index
    %96 = vector.load %arg9[%c0_42, %c0_43, %c0_44] : memref<2x1x32xf32, #tpu.memory_space<vmem>>, vector<1x1x32xf32>
    %97 = vector.shape_cast %96 : vector<1x1x32xf32> to vector<1x32xf32>
    %cst_45 = arith.constant dense<0.000000e+00> : vector<16xf32>
    %98 = vector.multi_reduction <add>, %93, %cst_45 [1] : vector<16x32xf32> to vector<16xf32>
    %99 = vector.shape_cast %98 : vector<16xf32> to vector<16x1xf32>
    %cst_46 = arith.constant 3.200000e+01 : f32
    %100 = vector.broadcast %cst_46 : f32 to vector<16x1xf32>
    %101 = arith.divf %99, %100 : vector<16x1xf32>
    %102 = vector.broadcast %101 : vector<16x1xf32> to vector<16x32xf32>
    %103 = arith.subf %93, %102 : vector<16x32xf32>
    %104 = arith.mulf %103, %103 : vector<16x32xf32>
    %cst_47 = arith.constant dense<0.000000e+00> : vector<16xf32>
    %105 = vector.multi_reduction <add>, %104, %cst_47 [1] : vector<16x32xf32> to vector<16xf32>
    %106 = vector.shape_cast %105 : vector<16xf32> to vector<16x1xf32>
    %cst_48 = arith.constant 3.200000e+01 : f32
    %107 = vector.broadcast %cst_48 : f32 to vector<16x1xf32>
    %108 = arith.divf %106, %107 : vector<16x1xf32>
    %109 = vector.broadcast %101 : vector<16x1xf32> to vector<16x32xf32>
    %110 = arith.subf %93, %109 : vector<16x32xf32>
    %cst_49 = arith.constant 9.99999996E-13 : f32
    %111 = vector.broadcast %cst_49 : f32 to vector<16x1xf32>
    %112 = arith.addf %108, %111 : vector<16x1xf32>
    %113 = math.rsqrt %112 : vector<16x1xf32>
    %114 = vector.broadcast %113 : vector<16x1xf32> to vector<16x32xf32>
    %115 = arith.mulf %110, %114 : vector<16x32xf32>
    %116 = vector.broadcast %95 : vector<1x32xf32> to vector<16x32xf32>
    %117 = arith.mulf %115, %116 : vector<16x32xf32>
    %118 = vector.broadcast %97 : vector<1x32xf32> to vector<16x32xf32>
    %119 = arith.addf %117, %118 : vector<16x32xf32>
    %c0_50 = arith.constant 0 : index
    %c0_51 = arith.constant 0 : index
    %c0_52 = arith.constant 0 : index
    %120 = vector.load %arg10[%c0_50, %c0_51, %c0_52] : memref<2x32x64xbf16, #tpu.memory_space<vmem>>, vector<1x32x64xbf16>
    %121 = vector.shape_cast %120 : vector<1x32x64xbf16> to vector<32x64xbf16>
    %122 = arith.truncf %119 : vector<16x32xf32> to vector<16x32xbf16>
    %cst_53 = arith.constant dense<0.000000e+00> : vector<16x64xf32>
    %123 = tpu.matmul %122, %121, %cst_53 {dimension_numbers = #tpu.dot_dimension_numbers<[1], [0], [0], [1], [0, 0, 1, 1], [], []>} : vector<16x32xbf16>, vector<32x64xbf16>, vector<16x64xf32> -> vector<16x64xf32>
    %c0_54 = arith.constant 0 : index
    %c0_55 = arith.constant 0 : index
    %c0_56 = arith.constant 0 : index
    %124 = vector.load %arg11[%c0_54, %c0_55, %c0_56] : memref<2x1x64xf32, #tpu.memory_space<vmem>>, vector<1x1x64xf32>
    %125 = vector.shape_cast %124 : vector<1x1x64xf32> to vector<1x64xf32>
    %126 = vector.broadcast %125 : vector<1x64xf32> to vector<16x64xf32>
    %127 = arith.addf %123, %126 : vector<16x64xf32>
    %cst_57 = arith.constant 5.000000e-01 : f32
    %128 = vector.broadcast %cst_57 : f32 to vector<16x64xf32>
    %129 = arith.mulf %128, %127 : vector<16x64xf32>
    %cst_58 = arith.constant 0.707106769 : f32
    %130 = vector.broadcast %cst_58 : f32 to vector<16x64xf32>
    %131 = arith.mulf %127, %130 : vector<16x64xf32>
    %132 = math.erf %131 : vector<16x64xf32>
    %cst_59 = arith.constant 1.000000e+00 : f32
    %133 = vector.broadcast %cst_59 : f32 to vector<16x64xf32>
    %134 = arith.addf %133, %132 : vector<16x64xf32>
    %135 = arith.mulf %129, %134 : vector<16x64xf32>
    %c0_60 = arith.constant 0 : index
    %c0_61 = arith.constant 0 : index
    %c0_62 = arith.constant 0 : index
    %136 = vector.load %arg12[%c0_60, %c0_61, %c0_62] : memref<2x64x32xbf16, #tpu.memory_space<vmem>>, vector<1x64x32xbf16>
    %137 = vector.shape_cast %136 : vector<1x64x32xbf16> to vector<64x32xbf16>
    %138 = arith.truncf %135 : vector<16x64xf32> to vector<16x64xbf16>
    %cst_63 = arith.constant dense<0.000000e+00> : vector<16x32xf32>
    %139 = tpu.matmul %138, %137, %cst_63 {dimension_numbers = #tpu.dot_dimension_numbers<[1], [0], [0], [1], [0, 0, 1, 1], [], []>} : vector<16x64xbf16>, vector<64x32xbf16>, vector<16x32xf32> -> vector<16x32xf32>
    %c0_64 = arith.constant 0 : index
    %c0_65 = arith.constant 0 : index
    %c0_66 = arith.constant 0 : index
    %140 = vector.load %arg13[%c0_64, %c0_65, %c0_66] : memref<2x1x32xf32, #tpu.memory_space<vmem>>, vector<1x1x32xf32>
    %141 = vector.shape_cast %140 : vector<1x1x32xf32> to vector<1x32xf32>
    %142 = vector.broadcast %141 : vector<1x32xf32> to vector<16x32xf32>
    %143 = arith.addf %139, %142 : vector<16x32xf32>
    %144 = arith.addf %143, %119 : vector<16x32xf32>
    %c0_67 = arith.constant 0 : index
    %c0_68 = arith.constant 0 : index
    %c0_69 = arith.constant 0 : index
    %145 = vector.load %arg14[%c0_67, %c0_68, %c0_69] : memref<2x1x32xf32, #tpu.memory_space<vmem>>, vector<1x1x32xf32>
    %146 = vector.shape_cast %145 : vector<1x1x32xf32> to vector<1x32xf32>
    %c0_70 = arith.constant 0 : index
    %c0_71 = arith.constant 0 : index
    %c0_72 = arith.constant 0 : index
    %147 = vector.load %arg15[%c0_70, %c0_71, %c0_72] : memref<2x1x32xf32, #tpu.memory_space<vmem>>, vector<1x1x32xf32>
    %148 = vector.shape_cast %147 : vector<1x1x32xf32> to vector<1x32xf32>
    %cst_73 = arith.constant dense<0.000000e+00> : vector<16xf32>
    %149 = vector.multi_reduction <add>, %144, %cst_73 [1] : vector<16x32xf32> to vector<16xf32>
    %150 = vector.shape_cast %149 : vector<16xf32> to vector<16x1xf32>
    %cst_74 = arith.constant 3.200000e+01 : f32
    %151 = vector.broadcast %cst_74 : f32 to vector<16x1xf32>
    %152 = arith.divf %150, %151 : vector<16x1xf32>
    %153 = vector.broadcast %152 : vector<16x1xf32> to vector<16x32xf32>
    %154 = arith.subf %144, %153 : vector<16x32xf32>
    %155 = arith.mulf %154, %154 : vector<16x32xf32>
    %cst_75 = arith.constant dense<0.000000e+00> : vector<16xf32>
    %156 = vector.multi_reduction <add>, %155, %cst_75 [1] : vector<16x32xf32> to vector<16xf32>
    %157 = vector.shape_cast %156 : vector<16xf32> to vector<16x1xf32>
    %cst_76 = arith.constant 3.200000e+01 : f32
    %158 = vector.broadcast %cst_76 : f32 to vector<16x1xf32>
    %159 = arith.divf %157, %158 : vector<16x1xf32>
    %160 = vector.broadcast %152 : vector<16x1xf32> to vector<16x32xf32>
    %161 = arith.subf %144, %160 : vector<16x32xf32>
    %cst_77 = arith.constant 9.99999996E-13 : f32
    %162 = vector.broadcast %cst_77 : f32 to vector<16x1xf32>
    %163 = arith.addf %159, %162 : vector<16x1xf32>
    %164 = math.rsqrt %163 : vector<16x1xf32>
    %165 = vector.broadcast %164 : vector<16x1xf32> to vector<16x32xf32>
    %166 = arith.mulf %161, %165 : vector<16x32xf32>
    %167 = vector.broadcast %146 : vector<1x32xf32> to vector<16x32xf32>
    %168 = arith.mulf %166, %167 : vector<16x32xf32>
    %169 = vector.broadcast %148 : vector<1x32xf32> to vector<16x32xf32>
    %170 = arith.addf %168, %169 : vector<16x32xf32>
    %c1 = arith.constant 1 : index
    %c0_78 = arith.constant 0 : index
    %c0_79 = arith.constant 0 : index
    %171 = vector.load %arg4[%c1, %c0_78, %c0_79] : memref<2x32x96xbf16, #tpu.memory_space<vmem>>, vector<1x32x96xbf16>
    %172 = vector.shape_cast %171 : vector<1x32x96xbf16> to vector<32x96xbf16>
    %173 = arith.truncf %170 : vector<16x32xf32> to vector<16x32xbf16>
    %cst_80 = arith.constant dense<0.000000e+00> : vector<16x96xf32>
    %174 = tpu.matmul %173, %172, %cst_80 {dimension_numbers = #tpu.dot_dimension_numbers<[1], [0], [0], [1], [0, 0, 1, 1], [], []>} : vector<16x32xbf16>, vector<32x96xbf16>, vector<16x96xf32> -> vector<16x96xf32>
    %c1_81 = arith.constant 1 : index
    %c0_82 = arith.constant 0 : index
    %c0_83 = arith.constant 0 : index
    %175 = vector.load %arg5[%c1_81, %c0_82, %c0_83] : memref<2x1x96xf32, #tpu.memory_space<vmem>>, vector<1x1x96xf32>
    %176 = vector.shape_cast %175 : vector<1x1x96xf32> to vector<1x96xf32>
    %177 = vector.broadcast %176 : vector<1x96xf32> to vector<16x96xf32>
    %178 = arith.addf %174, %177 : vector<16x96xf32>
    %179 = vector.extract_strided_slice %178 {offsets = [0, 0], sizes = [16, 16], strides = [1, 1]} : vector<16x96xf32> to vector<16x16xf32>
    %180 = vector.shape_cast %179 : vector<16x16xf32> to vector<2x8x16xf32>
    %181 = vector.extract_strided_slice %178 {offsets = [0, 32], sizes = [16, 16], strides = [1, 1]} : vector<16x96xf32> to vector<16x16xf32>
    %182 = vector.shape_cast %181 : vector<16x16xf32> to vector<2x8x16xf32>
    %183 = vector.extract_strided_slice %178 {offsets = [0, 64], sizes = [16, 16], strides = [1, 1]} : vector<16x96xf32> to vector<16x16xf32>
    %184 = vector.shape_cast %183 : vector<16x16xf32> to vector<2x8x16xf32>
    %185 = arith.truncf %180 : vector<2x8x16xf32> to vector<2x8x16xbf16>
    %186 = arith.truncf %182 : vector<2x8x16xf32> to vector<2x8x16xbf16>
    "tpu.trace_start"() <{level = 10 : i32, message = "bqd,bkd->bqk"}> : () -> ()
    %cst_84 = arith.constant dense<0.000000e+00> : vector<2x8x8xf32>
    %187 = tpu.matmul %185, %186, %cst_84 {dimension_numbers = #tpu.dot_dimension_numbers<[2], [2], [1], [1], [0, 0, 0, 1, 1, 1], [0], [0]>} : vector<2x8x16xbf16>, vector<2x8x16xbf16>, vector<2x8x8xf32> -> vector<2x8x8xf32>
    "tpu.trace_stop"() : () -> ()
    %188 = arith.addf %187, %0 : vector<2x8x8xf32>
    %cst_85 = arith.constant dense<0xFF800000> : vector<2x8xf32>
    %189 = vector.multi_reduction <maximumf>, %188, %cst_85 [2] : vector<2x8x8xf32> to vector<2x8xf32>
    %190 = vector.shape_cast %189 : vector<2x8xf32> to vector<2x8x1xf32>
    %191 = vector.broadcast %190 : vector<2x8x1xf32> to vector<2x8x8xf32>
    %192 = arith.subf %188, %191 : vector<2x8x8xf32>
    %193 = math.exp %192 : vector<2x8x8xf32>
    %cst_86 = arith.constant dense<0.000000e+00> : vector<2x8xf32>
    %194 = vector.multi_reduction <add>, %193, %cst_86 [2] : vector<2x8x8xf32> to vector<2x8xf32>
    %195 = vector.shape_cast %194 : vector<2x8xf32> to vector<2x8x1xf32>
    %196 = tpu.reciprocal %195 : vector<2x8x1xf32> -> vector<2x8x1xf32>
    %197 = vector.broadcast %196 : vector<2x8x1xf32> to vector<2x8x8xf32>
    %198 = arith.mulf %193, %197 : vector<2x8x8xf32>
    %199 = arith.truncf %198 : vector<2x8x8xf32> to vector<2x8x8xbf16>
    %200 = arith.truncf %184 : vector<2x8x16xf32> to vector<2x8x16xbf16>
    "tpu.trace_start"() <{level = 10 : i32, message = "bqk,bkd->bqd"}> : () -> ()
    %cst_87 = arith.constant dense<0.000000e+00> : vector<2x8x16xf32>
    %201 = tpu.matmul %199, %200, %cst_87 {dimension_numbers = #tpu.dot_dimension_numbers<[2], [1], [1], [2], [0, 0, 0, 1, 1, 2], [0], [0]>} : vector<2x8x8xbf16>, vector<2x8x16xbf16>, vector<2x8x16xf32> -> vector<2x8x16xf32>
    "tpu.trace_stop"() : () -> ()
    %202 = vector.shape_cast %201 : vector<2x8x16xf32> to vector<16x16xf32>
    %c0_88 = arith.constant 0 : index
    %c0_89 = arith.constant 0 : index
    %203 = vector.load %arg21[%c0_88, %c0_89] : memref<16x32xf32, #tpu.memory_space<vmem>>, vector<16x16xf32>
    tpu.vector_store %arg21[%c0_88, %c0_89], %202 {strides = array<i32>} : memref<16x32xf32, #tpu.memory_space<vmem>>, vector<16x16xf32>,
    %204 = vector.extract_strided_slice %178 {offsets = [0, 16], sizes = [16, 16], strides = [1, 1]} : vector<16x96xf32> to vector<16x16xf32>
    %205 = vector.shape_cast %204 : vector<16x16xf32> to vector<2x8x16xf32>
    %206 = vector.extract_strided_slice %178 {offsets = [0, 48], sizes = [16, 16], strides = [1, 1]} : vector<16x96xf32> to vector<16x16xf32>
    %207 = vector.shape_cast %206 : vector<16x16xf32> to vector<2x8x16xf32>
    %208 = vector.extract_strided_slice %178 {offsets = [0, 80], sizes = [16, 16], strides = [1, 1]} : vector<16x96xf32> to vector<16x16xf32>
    %209 = vector.shape_cast %208 : vector<16x16xf32> to vector<2x8x16xf32>
    %210 = arith.truncf %205 : vector<2x8x16xf32> to vector<2x8x16xbf16>
    %211 = arith.truncf %207 : vector<2x8x16xf32> to vector<2x8x16xbf16>
    "tpu.trace_start"() <{level = 10 : i32, message = "bqd,bkd->bqk"}> : () -> ()
    %cst_90 = arith.constant dense<0.000000e+00> : vector<2x8x8xf32>
    %212 = tpu.matmul %210, %211, %cst_90 {dimension_numbers = #tpu.dot_dimension_numbers<[2], [2], [1], [1], [0, 0, 0, 1, 1, 1], [0], [0]>} : vector<2x8x16xbf16>, vector<2x8x16xbf16>, vector<2x8x8xf32> -> vector<2x8x8xf32>
    "tpu.trace_stop"() : () -> ()
    %213 = arith.addf %212, %0 : vector<2x8x8xf32>
    %cst_91 = arith.constant dense<0xFF800000> : vector<2x8xf32>
    %214 = vector.multi_reduction <maximumf>, %213, %cst_91 [2] : vector<2x8x8xf32> to vector<2x8xf32>
    %215 = vector.shape_cast %214 : vector<2x8xf32> to vector<2x8x1xf32>
    %216 = vector.broadcast %215 : vector<2x8x1xf32> to vector<2x8x8xf32>
    %217 = arith.subf %213, %216 : vector<2x8x8xf32>
    %218 = math.exp %217 : vector<2x8x8xf32>
    %cst_92 = arith.constant dense<0.000000e+00> : vector<2x8xf32>
    %219 = vector.multi_reduction <add>, %218, %cst_92 [2] : vector<2x8x8xf32> to vector<2x8xf32>
    %220 = vector.shape_cast %219 : vector<2x8xf32> to vector<2x8x1xf32>
    %221 = tpu.reciprocal %220 : vector<2x8x1xf32> -> vector<2x8x1xf32>
    %222 = vector.broadcast %221 : vector<2x8x1xf32> to vector<2x8x8xf32>
    %223 = arith.mulf %218, %222 : vector<2x8x8xf32>
    %224 = arith.truncf %223 : vector<2x8x8xf32> to vector<2x8x8xbf16>
    %225 = arith.truncf %209 : vector<2x8x16xf32> to vector<2x8x16xbf16>
    "tpu.trace_start"() <{level = 10 : i32, message = "bqk,bkd->bqd"}> : () -> ()
    %cst_93 = arith.constant dense<0.000000e+00> : vector<2x8x16xf32>
    %226 = tpu.matmul %224, %225, %cst_93 {dimension_numbers = #tpu.dot_dimension_numbers<[2], [1], [1], [2], [0, 0, 0, 1, 1, 2], [0], [0]>} : vector<2x8x8xbf16>, vector<2x8x16xbf16>, vector<2x8x16xf32> -> vector<2x8x16xf32>
    "tpu.trace_stop"() : () -> ()
    %227 = vector.shape_cast %226 : vector<2x8x16xf32> to vector<16x16xf32>
    %c0_94 = arith.constant 0 : index
    %c16_95 = arith.constant 16 : index
    %228 = vector.load %arg21[%c0_94, %c16_95] : memref<16x32xf32, #tpu.memory_space<vmem>>, vector<16x16xf32>
    tpu.vector_store %arg21[%c0_94, %c16_95], %227 {strides = array<i32>} : memref<16x32xf32, #tpu.memory_space<vmem>>, vector<16x16xf32>,
    %c0_96 = arith.constant 0 : index
    %c0_97 = arith.constant 0 : index
    %229 = vector.load %arg21[%c0_96, %c0_97] : memref<16x32xf32, #tpu.memory_space<vmem>>, vector<16x32xf32>
    %c1_98 = arith.constant 1 : index
    %c0_99 = arith.constant 0 : index
    %c0_100 = arith.constant 0 : index
    %230 = vector.load %arg6[%c1_98, %c0_99, %c0_100] : memref<2x32x32xbf16, #tpu.memory_space<vmem>>, vector<1x32x32xbf16>
    %231 = vector.shape_cast %230 : vector<1x32x32xbf16> to vector<32x32xbf16>
    %232 = arith.truncf %229 : vector<16x32xf32> to vector<16x32xbf16>
    %cst_101 = arith.constant dense<0.000000e+00> : vector<16x32xf32>
    %233 = tpu.matmul %232, %231, %cst_101 {dimension_numbers = #tpu.dot_dimension_numbers<[1], [0], [0], [1], [0, 0, 1, 1], [], []>} : vector<16x32xbf16>, vector<32x32xbf16>, vector<16x32xf32> -> vector<16x32xf32>
    %c1_102 = arith.constant 1 : index
    %c0_103 = arith.constant 0 : index
    %c0_104 = arith.constant 0 : index
    %234 = vector.load %arg7[%c1_102, %c0_103, %c0_104] : memref<2x1x32xf32, #tpu.memory_space<vmem>>, vector<1x1x32xf32>
    %235 = vector.shape_cast %234 : vector<1x1x32xf32> to vector<1x32xf32>
    %236 = vector.broadcast %235 : vector<1x32xf32> to vector<16x32xf32>
    %237 = arith.addf %233, %236 : vector<16x32xf32>
    %238 = arith.addf %237, %170 : vector<16x32xf32>
    %c1_105 = arith.constant 1 : index
    %c0_106 = arith.constant 0 : index
    %c0_107 = arith.constant 0 : index
    %239 = vector.load %arg8[%c1_105, %c0_106, %c0_107] : memref<2x1x32xf32, #tpu.memory_space<vmem>>, vector<1x1x32xf32>
    %240 = vector.shape_cast %239 : vector<1x1x32xf32> to vector<1x32xf32>
    %c1_108 = arith.constant 1 : index
    %c0_109 = arith.constant 0 : index
    %c0_110 = arith.constant 0 : index
    %241 = vector.load %arg9[%c1_108, %c0_109, %c0_110] : memref<2x1x32xf32, #tpu.memory_space<vmem>>, vector<1x1x32xf32>
    %242 = vector.shape_cast %241 : vector<1x1x32xf32> to vector<1x32xf32>
    %cst_111 = arith.constant dense<0.000000e+00> : vector<16xf32>
    %243 = vector.multi_reduction <add>, %238, %cst_111 [1] : vector<16x32xf32> to vector<16xf32>
    %244 = vector.shape_cast %243 : vector<16xf32> to vector<16x1xf32>
    %cst_112 = arith.constant 3.200000e+01 : f32
    %245 = vector.broadcast %cst_112 : f32 to vector<16x1xf32>
    %246 = arith.divf %244, %245 : vector<16x1xf32>
    %247 = vector.broadcast %246 : vector<16x1xf32> to vector<16x32xf32>
    %248 = arith.subf %238, %247 : vector<16x32xf32>
    %249 = arith.mulf %248, %248 : vector<16x32xf32>
    %cst_113 = arith.constant dense<0.000000e+00> : vector<16xf32>
    %250 = vector.multi_reduction <add>, %249, %cst_113 [1] : vector<16x32xf32> to vector<16xf32>
    %251 = vector.shape_cast %250 : vector<16xf32> to vector<16x1xf32>
    %cst_114 = arith.constant 3.200000e+01 : f32
    %252 = vector.broadcast %cst_114 : f32 to vector<16x1xf32>
    %253 = arith.divf %251, %252 : vector<16x1xf32>
    %254 = vector.broadcast %246 : vector<16x1xf32> to vector<16x32xf32>
    %255 = arith.subf %238, %254 : vector<16x32xf32>
    %cst_115 = arith.constant 9.99999996E-13 : f32
    %256 = vector.broadcast %cst_115 : f32 to vector<16x1xf32>
    %257 = arith.addf %253, %256 : vector<16x1xf32>
    %258 = math.rsqrt %257 : vector<16x1xf32>
    %259 = vector.broadcast %258 : vector<16x1xf32> to vector<16x32xf32>
    %260 = arith.mulf %255, %259 : vector<16x32xf32>
    %261 = vector.broadcast %240 : vector<1x32xf32> to vector<16x32xf32>
    %262 = arith.mulf %260, %261 : vector<16x32xf32>
    %263 = vector.broadcast %242 : vector<1x32xf32> to vector<16x32xf32>
    %264 = arith.addf %262, %263 : vector<16x32xf32>
    %c1_116 = arith.constant 1 : index
    %c0_117 = arith.constant 0 : index
    %c0_118 = arith.constant 0 : index
    %265 = vector.load %arg10[%c1_116, %c0_117, %c0_118] : memref<2x32x64xbf16, #tpu.memory_space<vmem>>, vector<1x32x64xbf16>
    %266 = vector.shape_cast %265 : vector<1x32x64xbf16> to vector<32x64xbf16>
    %267 = arith.truncf %264 : vector<16x32xf32> to vector<16x32xbf16>
    %cst_119 = arith.constant dense<0.000000e+00> : vector<16x64xf32>
    %268 = tpu.matmul %267, %266, %cst_119 {dimension_numbers = #tpu.dot_dimension_numbers<[1], [0], [0], [1], [0, 0, 1, 1], [], []>} : vector<16x32xbf16>, vector<32x64xbf16>, vector<16x64xf32> -> vector<16x64xf32>
    %c1_120 = arith.constant 1 : index
    %c0_121 = arith.constant 0 : index
    %c0_122 = arith.constant 0 : index
    %269 = vector.load %arg11[%c1_120, %c0_121, %c0_122] : memref<2x1x64xf32, #tpu.memory_space<vmem>>, vector<1x1x64xf32>
    %270 = vector.shape_cast %269 : vector<1x1x64xf32> to vector<1x64xf32>
    %271 = vector.broadcast %270 : vector<1x64xf32> to vector<16x64xf32>
    %272 = arith.addf %268, %271 : vector<16x64xf32>
    %cst_123 = arith.constant 5.000000e-01 : f32
    %273 = vector.broadcast %cst_123 : f32 to vector<16x64xf32>
    %274 = arith.mulf %273, %272 : vector<16x64xf32>
    %cst_124 = arith.constant 0.707106769 : f32
    %275 = vector.broadcast %cst_124 : f32 to vector<16x64xf32>
    %276 = arith.mulf %272, %275 : vector<16x64xf32>
    %277 = math.erf %276 : vector<16x64xf32>
    %cst_125 = arith.constant 1.000000e+00 : f32
    %278 = vector.broadcast %cst_125 : f32 to vector<16x64xf32>
    %279 = arith.addf %278, %277 : vector<16x64xf32>
    %280 = arith.mulf %274, %279 : vector<16x64xf32>
    %c1_126 = arith.constant 1 : index
    %c0_127 = arith.constant 0 : index
    %c0_128 = arith.constant 0 : index
    %281 = vector.load %arg12[%c1_126, %c0_127, %c0_128] : memref<2x64x32xbf16, #tpu.memory_space<vmem>>, vector<1x64x32xbf16>
    %282 = vector.shape_cast %281 : vector<1x64x32xbf16> to vector<64x32xbf16>
    %283 = arith.truncf %280 : vector<16x64xf32> to vector<16x64xbf16>
    %cst_129 = arith.constant dense<0.000000e+00> : vector<16x32xf32>
    %284 = tpu.matmul %283, %282, %cst_129 {dimension_numbers = #tpu.dot_dimension_numbers<[1], [0], [0], [1], [0, 0, 1, 1], [], []>} : vector<16x64xbf16>, vector<64x32xbf16>, vector<16x32xf32> -> vector<16x32xf32>
    %c1_130 = arith.constant 1 : index
    %c0_131 = arith.constant 0 : index
    %c0_132 = arith.constant 0 : index
    %285 = vector.load %arg13[%c1_130, %c0_131, %c0_132] : memref<2x1x32xf32, #tpu.memory_space<vmem>>, vector<1x1x32xf32>
    %286 = vector.shape_cast %285 : vector<1x1x32xf32> to vector<1x32xf32>
    %287 = vector.broadcast %286 : vector<1x32xf32> to vector<16x32xf32>
    %288 = arith.addf %284, %287 : vector<16x32xf32>
    %289 = arith.addf %288, %264 : vector<16x32xf32>
    %c1_133 = arith.constant 1 : index
    %c0_134 = arith.constant 0 : index
    %c0_135 = arith.constant 0 : index
    %290 = vector.load %arg14[%c1_133, %c0_134, %c0_135] : memref<2x1x32xf32, #tpu.memory_space<vmem>>, vector<1x1x32xf32>
    %291 = vector.shape_cast %290 : vector<1x1x32xf32> to vector<1x32xf32>
    %c1_136 = arith.constant 1 : index
    %c0_137 = arith.constant 0 : index
    %c0_138 = arith.constant 0 : index
    %292 = vector.load %arg15[%c1_136, %c0_137, %c0_138] : memref<2x1x32xf32, #tpu.memory_space<vmem>>, vector<1x1x32xf32>
    %293 = vector.shape_cast %292 : vector<1x1x32xf32> to vector<1x32xf32>
    %cst_139 = arith.constant dense<0.000000e+00> : vector<16xf32>
    %294 = vector.multi_reduction <add>, %289, %cst_139 [1] : vector<16x32xf32> to vector<16xf32>
    %295 = vector.shape_cast %294 : vector<16xf32> to vector<16x1xf32>
    %cst_140 = arith.constant 3.200000e+01 : f32
    %296 = vector.broadcast %cst_140 : f32 to vector<16x1xf32>
    %297 = arith.divf %295, %296 : vector<16x1xf32>
    %298 = vector.broadcast %297 : vector<16x1xf32> to vector<16x32xf32>
    %299 = arith.subf %289, %298 : vector<16x32xf32>
    %300 = arith.mulf %299, %299 : vector<16x32xf32>
    %cst_141 = arith.constant dense<0.000000e+00> : vector<16xf32>
    %301 = vector.multi_reduction <add>, %300, %cst_141 [1] : vector<16x32xf32> to vector<16xf32>
    %302 = vector.shape_cast %301 : vector<16xf32> to vector<16x1xf32>
    %cst_142 = arith.constant 3.200000e+01 : f32
    %303 = vector.broadcast %cst_142 : f32 to vector<16x1xf32>
    %304 = arith.divf %302, %303 : vector<16x1xf32>
    %305 = vector.broadcast %297 : vector<16x1xf32> to vector<16x32xf32>
    %306 = arith.subf %289, %305 : vector<16x32xf32>
    %cst_143 = arith.constant 9.99999996E-13 : f32
    %307 = vector.broadcast %cst_143 : f32 to vector<16x1xf32>
    %308 = arith.addf %304, %307 : vector<16x1xf32>
    %309 = math.rsqrt %308 : vector<16x1xf32>
    %310 = vector.broadcast %309 : vector<16x1xf32> to vector<16x32xf32>
    %311 = arith.mulf %306, %310 : vector<16x32xf32>
    %312 = vector.broadcast %291 : vector<1x32xf32> to vector<16x32xf32>
    %313 = arith.mulf %311, %312 : vector<16x32xf32>
    %314 = vector.broadcast %293 : vector<1x32xf32> to vector<16x32xf32>
    %315 = arith.addf %313, %314 : vector<16x32xf32>
    %316 = vector.shape_cast %315 : vector<16x32xf32> to vector<2x8x32xf32>
    %317 = vector.extract_strided_slice %316 {offsets = [0, 0, 0], sizes = [2, 1, 32], strides = [1, 1, 1]} : vector<2x8x32xf32> to vector<2x1x32xf32>
    %318 = vector.shape_cast %317 : vector<2x1x32xf32> to vector<2x32xf32>
    %c0_144 = arith.constant 0 : index
    %c0_145 = arith.constant 0 : index
    %319 = vector.load %arg16[%c0_144, %c0_145] : memref<32x32xbf16, #tpu.memory_space<vmem>>, vector<32x32xbf16>
    %320 = arith.truncf %318 : vector<2x32xf32> to vector<2x32xbf16>
    %cst_146 = arith.constant dense<0.000000e+00> : vector<2x32xf32>
    %321 = tpu.matmul %320, %319, %cst_146 {dimension_numbers = #tpu.dot_dimension_numbers<[1], [0], [0], [1], [0, 0, 1, 1], [], []>} : vector<2x32xbf16>, vector<32x32xbf16>, vector<2x32xf32> -> vector<2x32xf32>
    %c0_147 = arith.constant 0 : index
    %c0_148 = arith.constant 0 : index
    %322 = vector.load %arg17[%c0_147, %c0_148] : memref<1x32xf32, #tpu.memory_space<vmem>>, vector<1x32xf32>
    %323 = vector.broadcast %322 : vector<1x32xf32> to vector<2x32xf32>
    %324 = arith.addf %321, %323 : vector<2x32xf32>
    %325 = math.tanh %324 : vector<2x32xf32>
    %c0_149 = arith.constant 0 : index
    %c0_150 = arith.constant 0 : index
    %326 = vector.load %arg18[%c0_149, %c0_150] : memref<32x3xbf16, #tpu.memory_space<vmem>>, vector<32x3xbf16>
    %327 = arith.truncf %325 : vector<2x32xf32> to vector<2x32xbf16>
    %cst_151 = arith.constant dense<0.000000e+00> : vector<2x3xf32>
    %328 = tpu.matmul %327, %326, %cst_151 {dimension_numbers = #tpu.dot_dimension_numbers<[1], [0], [0], [1], [0, 0, 1, 1], [], []>} : vector<2x32xbf16>, vector<32x3xbf16>, vector<2x3xf32> -> vector<2x3xf32>
    %c0_152 = arith.constant 0 : index
    %c0_153 = arith.constant 0 : index
    %329 = vector.load %arg19[%c0_152, %c0_153] : memref<1x3xf32, #tpu.memory_space<vmem>>, vector<1x3xf32>
    %330 = vector.broadcast %329 : vector<1x3xf32> to vector<2x3xf32>
    %331 = arith.addf %328, %330 : vector<2x3xf32>
    %c0_154 = arith.constant 0 : index
    %c0_155 = arith.constant 0 : index
    %332 = vector.load %arg20[%c0_154, %c0_155] : memref<2x3xf32, #tpu.memory_space<vmem>>, vector<2x3xf32>
    tpu.vector_store %arg20[%c0_154, %c0_155], %331 {strides = array<i32>} : memref<2x3xf32, #tpu.memory_space<vmem>>, vector<2x3xf32>,
    return
  }
}

</mosaic_0001>

<bundles_post_ra>
// kernel: bert_classifier_forward.1
= control target key start
LH: loop header
LB: loop body
LE: loop exit
PB: predicated region body
PF: predicated region fallthrough
CT: control target
= control target key end

     0   :  { %s2402_s0 = inlined_call_operand.vmem [shape: f32[16,32], index: 0, kind: input, shape index: {}]   ;;  %s2403_s1 = inlined_call_operand.vmem [shape: f32[2,8,8], index: 1, kind: input, shape index: {}]   ;;  %s2404_s2 = inlined_call_operand.vmem [shape: f32[1,32], index: 2, kind: input, shape index: {}]   ;;  %s2405_s3 = inlined_call_operand.vmem [shape: f32[1,32], index: 3, kind: input, shape index: {}]   ;;  %s2406_s4 = inlined_call_operand.vmem [shape: bf16[2,32,96], index: 4, kind: input, shape index: {}]   ;;  %s2407_s5 = inlined_call_operand.vmem [shape: f32[2,1,96], index: 5, kind: input, shape index: {}]   ;;  %s2408_s6 = inlined_call_operand.vmem [shape: bf16[2,32,32], index: 6, kind: input, shape index: {}]   ;;  %s2409_s7 = inlined_call_operand.vmem [shape: f32[2,1,32], index: 7, kind: input, shape index: {}]   ;;  %s2410_s8 = inlined_call_operand.vmem [shape: f32[2,1,32], index: 8, kind: input, shape index: {}]   ;;  %s2411_s9 = inlined_call_operand.vmem [shape: f32[2,1,32], index: 9, kind: input, shape index: {}]   ;;  %s2412_s10 = inlined_call_operand.vmem [shape: bf16[2,32,64], index: 10, kind: input, shape index: {}]   ;;  %s2413_s11 = inlined_call_operand.vmem [shape: f32[2,1,64], index: 11, kind: input, shape index: {}]   ;;  %s2414_s12 = inlined_call_operand.vmem [shape: bf16[2,64,32], index: 12, kind: input, shape index: {}]   ;;  %s2415_s13 = inlined_call_operand.vmem [shape: f32[2,1,32], index: 13, kind: input, shape index: {}]   ;;  %s2416_s14 = inlined_call_operand.vmem [shape: f32[2,1,32], index: 14, kind: input, shape index: {}]   ;;  %s2417_s15 = inlined_call_operand.vmem [shape: f32[2,1,32], index: 15, kind: input, shape index: {}]   ;;  %s2418_s16 = inlined_call_operand.vmem [shape: bf16[32,32], index: 16, kind: input, shape index: {}]   ;;  %s2419_s17 = inlined_call_operand.vmem [shape: f32[1,32], index: 17, kind: input, shape index: {}]   ;;  %s2420_s18 = inlined_call_operand.vmem [shape: bf16[32,3], index: 18, kind: input, shape index: {}]   ;;  %s2421_s19 = inlined_call_operand.vmem [shape: f32[1,3], index: 19, kind: input, shape index: {}]   ;;  %s2422_s20 = inlined_call_operand.hbm [shape: f32[2,3], index: 20, kind: output, shape index: {}]  }
   0x1   :  { %2426 = sst [smem:[#allocation6_spill]] %s2402_s0 }
   0x2   :  { %2427 = sst [smem:[#allocation7_spill]] %s2403_s1 }
   0x3   :  { %2428 = sst [smem:[#allocation8_spill]] %s2404_s2 }
   0x4   :  { %2429 = sst [smem:[#allocation9_spill]] %s2405_s3 }
   0x5   :  { %2430 = sst [smem:[#allocation10_spill]] %s2406_s4 }
   0x6   :  { %s2431_s23 = sld [smem:[#allocation6_spill]]  ;;  %vm73_vm0 = vcmask 261120  }
   0xc   :  { %v69_v0 = vld [vmem:[%s2431_s23] sm:$0xff]  ;;  %v70_v1 = vld [vmem:[%s2431_s23 + $0x8] sm:$0xff] }
   0xd   :  { %v74_v2 = vsel %vm73_vm0, %v69_v0, 0.0  ;;  %v77_v3 = vsel %vm73_vm0, %v70_v1, 0.0 }
   0xe   :  { %75 = vadd.xlane.f32.xlu0 %v74_v2 }
   0xf   :  { %25 = vsyncpa [#allocation4], 0  ;;  %v1882_v4 = vmov 32.0   ;;  %s2432_s26 = sld [smem:[#allocation10_spill]]  ;;  %v1774_v52 = vld [vmem:[%s2407_s5] ss:$0 sm:$0xff] }
  0x10   :  { %1792 = vrcp.f32 %v1882_v4  ;;  %s2433_s30 = sld [smem:[#allocation8_spill]]  ;;  %s1883_s24 = smov 80   ;;  %vm180_vm8 = vcmask 130048   ;;  %vm224_vm9 = vcmask 64512   ;;  %vm280_vm10 = vcmask 1043456  }
  0x11   :  { %s2434_s1 = sld [smem:[#allocation9_spill]]  ;;  %s1884_s2 = smov 96  }
  0x12   :  { %s1885_s25 = smov 112   ;;  %s2435_s28 = sld [smem:[#allocation7_spill]] }
  0x13   :  { %s1887_s0 = smov 48   ;;  %s1888_s21 = smov 16  }
  0x14   :  { %s1889_s4 = smov [#allocation3]   ;;  %s1577_s29 = sshll.u32 %s2422_s20, 4  ;;  %s1578_s29 = int_to_ptr.hbm [resolvable:$true] %s1577_s29 }
  0x15   :  { %v1741_v21 = vld [vmem:[%s2432_s26 + $0x8] sm:$0xff]  ;;  %v1740_v23 = vld [vmem:[%s2432_s26] sm:$0xff] }
  0x16   :  { %78 = vadd.xlane.f32.xlu0 %v77_v3  ;;  %v1793_v5 = vpop.eup %1792  ;;  %165 = vmatpush.bf16.msra.mxu0 %v1741_v21  ;;  %v1772_v42 = vld [vmem:[%s2433_s30] ss:$0 sm:$0xff]  ;;  %s1886_s30 = smov 64  }
  0x17   :  { %v81_v6 = vmul.f32 32.0, %v1793_v5  ;;  %vm85_vm1 = vweird.f32 %v1793_v5  ;;  %v1773_v47 = vld [vmem:[%s2434_s1] ss:$0 sm:$0xff] }
  0x19   :  { %v82_v7 = vsub.f32 1.0, %v81_v6 }
  0x1a   :  { %166 = vmatpush.bf16.msra.mxu0 %v1740_v23 }
  0x1b   :  { %v83_v8 = vmul.f32 %v1793_v5, %v82_v7 }
  0x1d   :  { %v84_v9 = vadd.f32 %v1793_v5, %v83_v8 }
  0x1f   :  { %v2003_v10 = vsel %vm85_vm1, %v1793_v5, %v84_v9  ;;  %v2060_v9 = vld [vmem:[%s2435_s28] sm:$0xff] }
  0x81   :  { %v76_v11 = vpop.xlane.xlu0 %75 }
  0x82   :  { %v87_v12 = vmul.f32 %v2003_v10, %v76_v11 }
  0x84   :  { %v89_v13 = vsub.f32 %v69_v0, %v87_v12 }
  0x86   :  { %v91_v14 = vmul.f32 %v89_v13, %v89_v13 }
  0x88   :  { %v93_v15 = vsel %vm73_vm0, %v91_v14, 0.0 }
  0x89   :  { %94 = vadd.xlane.f32.xlu1 %v93_v15  ;;  %v79_v16 = vpop.xlane.xlu0 %78  ;;  %v2067_v15 = vld [vmem:[%s2435_s28 + $0x8] sm:$0xff] }
  0x8a   :  { %v88_v17 = vmul.f32 %v2003_v10, %v79_v16 }
  0x8c   :  { %v90_v18 = vsub.f32 %v70_v1, %v88_v17 }
  0x8e   :  { %v92_v19 = vmul.f32 %v90_v18, %v90_v18 }
  0x90   :  { %v96_v20 = vsel %vm73_vm0, %v92_v19, 0.0 }
  0x91   :  { %97 = vadd.xlane.f32.xlu1 %v96_v20 }
  0xfc   :  { %v95_v22 = vpop.xlane.xlu1 %94 }
  0xfd   :  { %v99_v24 = vmul.f32 %v95_v22, %v2003_v10 }
  0xff   :  { %v101_v25 = vadd.f32 1e-12, %v99_v24 }
 0x101   :  { %1794 = vrsqrt.f32 %v101_v25  ;;  %vm109_vm3 = vweird.f32 %v101_v25 }
 0x104   :  { %v98_v26 = vpop.xlane.xlu1 %97 }
 0x105   :  { %v100_v27 = vmul.f32 %v98_v26, %v2003_v10 }
 0x107   :  { %v1795_v28 = vpop.eup %1794  ;;  %v102_v29 = vadd.f32 1e-12, %v100_v27 }
 0x108   :  { %v104_v30 = vmul.f32 %v1795_v28, %v101_v25  ;;  %vm110_vm2 = vweird.f32 %v1795_v28 }
 0x109   :  { %1796 = vrsqrt.f32 %v102_v29  ;;  %vm111_vm4 = vmor %vm109_vm3, %vm110_vm2  ;;  %vm119_vm6 = vweird.f32 %v102_v29 }
 0x10a   :  { %v105_v31 = vmul.f32 %v1795_v28, %v104_v30 }
 0x10c   :  { %v106_v32 = vmul.f32 0.5, %v105_v31 }
 0x10e   :  { %v107_v33 = vsub.f32 1.5, %v106_v32 }
 0x10f   :  { %v1797_v34 = vpop.eup %1796 }
 0x110   :  { %v108_v35 = vmul.f32 %v1795_v28, %v107_v33  ;;  %v114_v36 = vmul.f32 %v1797_v34, %v102_v29  ;;  %vm120_vm5 = vweird.f32 %v1797_v34 }
 0x111   :  { %vm121_vm7 = vmor %vm119_vm6, %vm120_vm5 }
 0x112   :  { %v115_v37 = vmul.f32 %v1797_v34, %v114_v36  ;;  %v112_v38 = vsel %vm111_vm4, %v1795_v28, %v108_v35 }
 0x113   :  { %v123_v41 = vmul.f32 %v112_v38, %v89_v13 }
 0x114   :  { %v116_v39 = vmul.f32 0.5, %v115_v37 }
 0x115   :  { %v128_v46 = vmul.f32 %v1772_v42, %v123_v41 }
 0x116   :  { %v117_v40 = vsub.f32 1.5, %v116_v39 }
 0x117   :  { %v2023_v49 = vadd.f32 %v1773_v47, %v128_v46 }
 0x118   :  { %v118_v43 = vmul.f32 %v1797_v34, %v117_v40 }
 0x11a   :  { %v122_v44 = vsel %vm121_vm7, %v1797_v34, %v118_v43 }
 0x11b   :  { %v124_v45 = vmul.f32 %v122_v44, %v90_v18 }
 0x11d   :  { %v129_v48 = vmul.f32 %v1772_v42, %v124_v45 }
 0x11f   :  { %v2025_v50 = vadd.f32 %v1773_v47, %v129_v48 }
 0x121   :  { %v139_v51 = vpack.c.bf16 %v2025_v50, %v2023_v49 }
 0x123   :  { %1594 = vmatmul.msk.bf16.vlgmr.msra.gmra.mxu0 %vm73_vm0, %v139_v51 }
 0x1a0   :  { %v168_v53 = vpop.f32.mrf.mxu0 }
 0x1a1   :  { %v169_v54 = vadd.f32 %v1774_v52, %v168_v53 }
 0x1a3   :  { %v173_v55 = vpack.c.bf16 %v169_v54, %v169_v54 }
 0x1a5   :  { %v176_v56 = vunpack.c.l.b16 %v173_v55 }
 0x1a7   :  { %v2033_v57 = vpack.c.b16 %v176_v56, %v176_v56 }
 0x1a8   :  { %v170_v58 = vpop.f32.mrf.mxu0 }
 0x1a9   :  { %v171_v59 = vadd.f32 %v1774_v52, %v170_v58  ;;  %322 = vrot.lane.b32.xlu0 %v2033_v57, %s1883_s24  ;;  %178 = vrot.lane.b32.xlu2 %v2033_v57, %s1884_s2 }
 0x1ab   :  { %v174_v60 = vpack.c.bf16 %v171_v59, %v171_v59 }
 0x1ad   :  { %v201_v61 = vunpack.c.l.b16 %v174_v60 }
 0x1af   :  { %v2039_v62 = vpack.c.b16 %v201_v61, %v201_v61 }
 0x1b1   :  { %345 = vrot.lane.b32.xlu1 %v2039_v62, %s1883_s24  ;;  %203 = vrot.lane.b32.xlu2 %v2039_v62, %s1884_s2 }
 0x1b9   :  { %320 = vrot.lane.b32.xlu2 %v2033_v57, %s1885_s25 }
 0x1c1   :  { %343 = vrot.lane.b32.xlu2 %v2039_v62, %s1885_s25 }
 0x203   :  { %v179_v63 = vpop.permute.xlu2 %178 }
 0x204   :  { %v185_v0 = vsel %vm180_vm8, %v179_v63, 0 }
 0x205   :  { %194 = vmatpush.bf16.xpose.msra.mxu1 %v185_v0 }
 0x20b   :  { %v204_v1 = vpop.permute.xlu2 %203 }
 0x20c   :  { %1595 = vmatmul.msk.bf16.vlgmr.msra.gmra.mxu1 %vm180_vm8, %v173_v55  ;;  %v209_v2 = vsel %vm180_vm8, %v204_v1, 0 }
 0x20d   :  { %218 = vmatpush.bf16.xpose.msra.mxu2 %v209_v2 }
 0x213   :  { %v321_v5 = vpop.permute.xlu2 %320 }
 0x214   :  { %1596 = vmatmul.msk.bf16.vlgmr.msra.gmra.mxu2 %vm180_vm8, %v174_v60 }
 0x21b   :  { %v323_v3 = vpop.permute.xlu0 %322  ;;  %v344_v8 = vpop.permute.xlu2 %343 }
 0x21c   :  { %v328_v4 = vsel %vm180_vm8, %v323_v3, 0 }
 0x21d   :  { %337 = vmatpush.bf16.xpose.msrb.mxu0 %v328_v4 }
 0x223   :  { %v346_v6 = vpop.permute.xlu1 %345 }
 0x224   :  { %1599 = vmatmul.msk.bf16.vlgmr.msrb.gmra.mxu0 %vm180_vm8, %v321_v5  ;;  %v351_v7 = vsel %vm180_vm8, %v346_v6, 0 }
 0x225   :  { %360 = vmatpush.bf16.xpose.msrb.mxu1 %v351_v7 }
 0x22c   :  { %1600 = vmatmul.msk.bf16.vlgmr.msrb.gmra.mxu1 %vm180_vm8, %v344_v8 }
 0x289   :  { %v196_v11 = vpop.f32.mrf.mxu1 }
 0x28a   :  { %v197_v12 = vadd.f32 %v196_v11, %v2060_v9 }
 0x28c   :  { %v225_v13 = vsel %vm224_vm9, %v197_v12, -inf }
 0x28d   :  { %226 = vmax.xlane.f32.xlu2 %v225_v13 }
 0x291   :  { %v198_v14 = vpop.f32.mrf.mxu1 }
 0x297   :  { %v220_v16 = vpop.f32.mrf.mxu2 }
 0x298   :  { %v221_v17 = vadd.f32 %v220_v16, %v2067_v15 }
 0x29a   :  { %v228_v18 = vsel %vm224_vm9, %v221_v17, -inf }
 0x29b   :  { %229 = vmax.xlane.f32.xlu0 %v228_v18 }
 0x29f   :  { %v222_v19 = vpop.f32.mrf.mxu2 }
 0x2a1   :  { %v339_v20 = vpop.f32.mrf.mxu0 }
 0x2a2   :  { %v340_v21 = vadd.f32 %v339_v20, %v2060_v9 }
 0x2a4   :  { %v366_v22 = vsel %vm224_vm9, %v340_v21, -inf }
 0x2a5   :  { %367 = vmax.xlane.f32.xlu1 %v366_v22 }
 0x2a9   :  { %v341_v23 = vpop.f32.mrf.mxu0  ;;  %v362_v24 = vpop.f32.mrf.mxu1 }
 0x2aa   :  { %v363_v25 = vadd.f32 %v362_v24, %v2067_v15 }
 0x2ac   :  { %v369_v26 = vsel %vm224_vm9, %v363_v25, -inf }
 0x2ad   :  { %370 = vmax.xlane.f32.xlu2 %v369_v26 }
 0x2b1   :  { %v364_v27 = vpop.f32.mrf.mxu1 }
 0x2be   :  { %275 = vrot.lane.b32.xlu1 %v2033_v57, %s1886_s30 }
 0x2c6   :  { %437 = vrot.lane.b32.xlu1 %v2039_v62, %s1887_s0 }
 0x300   :  { %v227_v28 = vpop.xlane.xlu2 %226 }
 0x301   :  { %v231_v29 = vsub.f32 %v197_v12, %v227_v28 }
 0x303   :  { %v233_v30 = vmul.f32 1.442695, %v231_v29 }
 0x305   :  { %1798 = vpow2.f32 %v233_v30 }
 0x30b   :  { %v1799_v31 = vpop.eup %1798 }
 0x30c   :  { %v237_v32 = vsel %vm224_vm9, %v1799_v31, 0.0 }
 0x30d   :  { %238 = vadd.xlane.f32.xlu0 %v237_v32 }
 0x30e   :  { %v230_v33 = vpop.xlane.xlu0 %229 }
 0x30f   :  { %v232_v34 = vsub.f32 %v221_v17, %v230_v33 }
 0x311   :  { %v235_v35 = vmul.f32 1.442695, %v232_v34 }
 0x313   :  { %1800 = vpow2.f32 %v235_v35 }
 0x318   :  { %v368_v36 = vpop.xlane.xlu1 %367 }
 0x319   :  { %v2080_v37 = vpop.eup %1800  ;;  %v372_v38 = vsub.f32 %v340_v21, %v368_v36 }
 0x31a   :  { %v240_v39 = vsel %vm224_vm9, %v2080_v37, 0.0 }
 0x31b   :  { %v374_v40 = vmul.f32 1.442695, %v372_v38  ;;  %241 = vadd.xlane.f32.xlu2 %v240_v39 }
 0x31d   :  { %1802 = vpow2.f32 %v374_v40 }
 0x320   :  { %v371_v41 = vpop.xlane.xlu2 %370 }
 0x321   :  { %v373_v42 = vsub.f32 %v363_v25, %v371_v41 }
 0x323   :  { %v2084_v43 = vpop.eup %1802  ;;  %v376_v44 = vmul.f32 1.442695, %v373_v42 }
 0x324   :  { %v378_v45 = vsel %vm224_vm9, %v2084_v43, 0.0 }
 0x325   :  { %1804 = vpow2.f32 %v376_v44  ;;  %379 = vadd.xlane.f32.xlu0 %v378_v45 }
 0x32b   :  { %v2088_v46 = vpop.eup %1804 }
 0x32c   :  { %v381_v47 = vsel %vm224_vm9, %v2088_v46, 0.0 }
 0x32d   :  { %382 = vadd.xlane.f32.xlu2 %v381_v47 }
 0x330   :  { %v276_v48 = vpop.permute.xlu1 %275 }
 0x331   :  { %v282_v51 = vsel %vm280_vm10, %v276_v48, 0 }
 0x332   :  { %291 = vmatpush.bf16.msra.mxu3 %v282_v51 }
 0x339   :  { %297 = vrot.lane.b32.xlu0 %v2039_v62, %s1886_s30 }
 0x345   :  { %416 = vrot.lane.b32.xlu2 %v2033_v57, %s1887_s0 }
 0x380   :  { %v239_v52 = vpop.xlane.xlu0 %238 }
 0x381   :  { %1806 = vrcp.f32 %v239_v52  ;;  %v254_v56 = vand.u32 2147483648, %v239_v52  ;;  %v252_v59 = vand.u32 2147483647, %v239_v52  ;;  %vm248_vm12 = vweird.f32 %v239_v52 }
 0x383   :  { %v255_v63 = vor.u32 1.1754944e-38, %v254_v56  ;;  %vm253_vm14 = vcmp.eq.f32.partialorder %v252_v59, 8.507059e+37 }
 0x387   :  { %v1807_v53 = vpop.eup %1806 }
 0x388   :  { %v244_v54 = vmul.f32 %v1807_v53, %v239_v52  ;;  %vm249_vm11 = vweird.f32 %v1807_v53 }
 0x389   :  { %vm250_vm13 = vmor %vm248_vm12, %vm249_vm11 }
 0x38a   :  { %v245_v55 = vsub.f32 1.0, %v244_v54 }
 0x38c   :  { %v246_v58 = vmul.f32 %v1807_v53, %v245_v55 }
 0x38e   :  { %v242_v60 = vpop.xlane.xlu2 %241  ;;  %v247_v61 = vadd.f32 %v1807_v53, %v246_v58 }
 0x38f   :  { %1808 = vrcp.f32 %v242_v60  ;;  %v268_v13 = vand.u32 2147483648, %v242_v60  ;;  %vm262_vm1 = vweird.f32 %v242_v60  ;;  %v266_v14 = vand.u32 2147483647, %v242_v60 }
 0x390   :  { %v251_v0 = vsel %vm250_vm13, %v1807_v53, %v247_v61  ;;  %v1742_v61 = vld [vmem:[%s2408_s6] sm:$0xff] }
 0x391   :  { %v256_v62 = vsel %vm253_vm14, %v255_v63, %v251_v0  ;;  %v269_v21 = vor.u32 1.1754944e-38, %v268_v13  ;;  %vm267_vm4 = vcmp.eq.f32.partialorder %v266_v14, 8.507059e+37 }
 0x392   :  { %v271_v1 = vmul.f32 %v1799_v31, %v256_v62  ;;  %v438_v31 = vpop.permute.xlu1 %437 }
 0x393   :  { %v443_v40 = vsel %vm280_vm10, %v438_v31, 0 }
 0x394   :  { %v273_v57 = vpack.c.bf16 %v271_v1, %v271_v1 }
 0x395   :  { %v1809_v2 = vpop.eup %1808 }
 0x396   :  { %v258_v3 = vmul.f32 %v1809_v2, %v242_v60  ;;  %1597 = vmatmul.msk.bf16.vlgmr.msra.gmra.mxu3 %vm224_vm9, %v273_v57  ;;  %vm263_vm15 = vweird.f32 %v1809_v2  ;;  %v1743_v60 = vld [vmem:[%s2408_s6 + $0x8] sm:$0xff] }
 0x397   :  { %vm264_vm2 = vmor %vm262_vm1, %vm263_vm15  ;;  %501 = vmatpush.bf16.msra.mxu0 %v1743_v60  ;;  %vm466_vm15 = vcmask 261248  }
 0x398   :  { %v259_v4 = vsub.f32 1.0, %v258_v3  ;;  %v380_v5 = vpop.xlane.xlu0 %379 }
 0x399   :  { %1810 = vrcp.f32 %v380_v5  ;;  %v395_v17 = vand.u32 2147483648, %v380_v5  ;;  %v393_v19 = vand.u32 2147483647, %v380_v5  ;;  %vm389_vm5 = vweird.f32 %v380_v5 }
 0x39a   :  { %v260_v6 = vmul.f32 %v1809_v2, %v259_v4 }
 0x39b   :  { %v396_v24 = vor.u32 1.1754944e-38, %v395_v17  ;;  %vm394_vm7 = vcmp.eq.f32.partialorder %v393_v19, 8.507059e+37  ;;  %502 = vmatpush.bf16.msra.mxu0 %v1742_v61 }
 0x39c   :  { %v261_v8 = vadd.f32 %v1809_v2, %v260_v6 }
 0x39e   :  { %v265_v20 = vsel %vm264_vm2, %v1809_v2, %v261_v8  ;;  %v1775_v2 = vld [vmem:[%s2409_s7] ss:$0 sm:$0xff] }
 0x39f   :  { %v1811_v7 = vpop.eup %1810  ;;  %v270_v25 = vsel %vm267_vm4, %v269_v21, %v265_v20 }
 0x3a0   :  { %v385_v11 = vmul.f32 %v1811_v7, %v380_v5  ;;  %v383_v12 = vpop.xlane.xlu2 %382  ;;  %vm390_vm3 = vweird.f32 %v1811_v7  ;;  %v272_v34 = vmul.f32 %v2080_v37, %v270_v25  ;;  %v1744_v25 = vld [vmem:[%s2412_s10] sm:$0xff] }
 0x3a1   :  { %1812 = vrcp.f32 %v383_v12  ;;  %vm391_vm6 = vmor %vm389_vm5, %vm390_vm3  ;;  %v409_v44 = vand.u32 2147483648, %v383_v12  ;;  %vm403_vm12 = vweird.f32 %v383_v12 }
 0x3a2   :  { %v386_v16 = vsub.f32 1.0, %v385_v11  ;;  %v274_v41 = vpack.c.bf16 %v272_v34, %v272_v34 }
 0x3a3   :  { %v410_v45 = vor.u32 1.1754944e-38, %v409_v44  ;;  %v1776_v44 = vld [vmem:[%s2410_s8] ss:$0 sm:$0xff] }
 0x3a4   :  { %v387_v18 = vmul.f32 %v1811_v7, %v386_v16 }
 0x3a6   :  { %v388_v22 = vadd.f32 %v1811_v7, %v387_v18 }
 0x3a7   :  { %v1813_v23 = vpop.eup %1812 }
 0x3a8   :  { %v399_v26 = vmul.f32 %v1813_v23, %v383_v12  ;;  %v417_v27 = vpop.permute.xlu2 %416  ;;  %v392_v28 = vsel %vm391_vm6, %v1811_v7, %v388_v22  ;;  %vm404_vm11 = vweird.f32 %v1813_v23 }
 0x3a9   :  { %v422_v29 = vsel %vm280_vm10, %v417_v27, 0  ;;  %v397_v30 = vsel %vm394_vm7, %v396_v24, %v392_v28  ;;  %vm405_vm13 = vmor %vm403_vm12, %vm404_vm11 }
 0x3aa   :  { %v400_v32 = vsub.f32 1.0, %v399_v26  ;;  %431 = vmatpush.bf16.msrb.mxu2 %v422_v29  ;;  %v412_v33 = vmul.f32 %v2084_v43, %v397_v30  ;;  %v407_v43 = vand.u32 2147483647, %v383_v12 }
 0x3ab   :  { %v298_v35 = vpop.permute.xlu0 %297 }
 0x3ac   :  { %v401_v36 = vmul.f32 %v1813_v23, %v400_v32  ;;  %v303_v38 = vsel %vm280_vm10, %v298_v35, 0  ;;  %v414_v39 = vpack.c.bf16 %v412_v33, %v412_v33  ;;  %vm408_vm14 = vcmp.eq.f32.partialorder %v407_v43, 8.507059e+37 }
 0x3ad   :  { %312 = vmatpush.bf16.msrb.mxu3 %v303_v38 }
 0x3ae   :  { %1601 = vmatmul.msk.bf16.vlgmr.msrb.gmra.mxu2 %vm224_vm9, %v414_v39  ;;  %v402_v42 = vadd.f32 %v1813_v23, %v401_v36 }
 0x3b0   :  { %1598 = vmatmul.msk.bf16.vlgmr.msrb.gmra.mxu3 %vm224_vm9, %v274_v41  ;;  %v406_v37 = vsel %vm405_vm13, %v1813_v23, %v402_v42 }
 0x3b1   :  { %452 = vmatpush.bf16.msra.mxu3 %v443_v40  ;;  %v411_v47 = vsel %vm408_vm14, %v410_v45, %v406_v37 }
 0x3b2   :  { %v413_v48 = vmul.f32 %v2088_v46, %v411_v47  ;;  %v1777_v47 = vld [vmem:[%s2411_s9] ss:$0 sm:$0xff] }
 0x3b4   :  { %v415_v51 = vpack.c.bf16 %v413_v48, %v413_v48 }
 0x3c0   :  { %1602 = vmatmul.msk.bf16.vlgmr.msra.gmra.mxu3 %vm224_vm9, %v415_v51 }
 0x419   :  { %v293_v52 = vpop.f32.mrf.mxu3 }
 0x41a   :  { %318 = vst.msk [vmem:[#allocation2] sm:$0xff] %vm180_vm8, %v293_v52 }
 0x421   :  { %v295_v53 = vpop.f32.mrf.mxu3 }
 0x431   :  { %v433_v54 = vpop.f32.mrf.mxu2 }
 0x432   :  { %460 = vrot.lane.b32.xlu0 %v433_v54, %s1888_s21 }
 0x433   :  { %v314_v55 = vpop.f32.mrf.mxu3 }
 0x434   :  { %319 = vst.msk [vmem:[#allocation2 + $0x8] sm:$0xff] %vm180_vm8, %v314_v55 }
 0x439   :  { %v435_v56 = vpop.f32.mrf.mxu2 }
 0x43a   :  { %v1778_v56 = vld [vmem:[%s2413_s11] ss:$0 sm:$0xff] }
 0x43b   :  { %v316_v58 = vpop.f32.mrf.mxu3 }
 0x443   :  { %v454_v59 = vpop.f32.mrf.mxu3 }
 0x444   :  { %462 = vrot.lane.b32.xlu1 %v454_v59, %s1888_s21 }
 0x44b   :  { %v456_v46 = vpop.f32.mrf.mxu3 }
 0x4a4   :  { %v461_v63 = vpop.permute.xlu0 %460 }
 0x4a5   :  { %467 = vst.msk [vmem:[#allocation2] sm:$0xff] %vm466_vm15, %v461_v63 }
 0x4ac   :  { %v469_v62 = vld [vmem:[#allocation2] sm:$0xff] }
 0x4b6   :  { %v463_v0 = vpop.permute.xlu1 %462 }
 0x4b7   :  { %468 = vst.msk [vmem:[#allocation2 + $0x8] sm:$0xff] %vm466_vm15, %v463_v0 }
 0x4be   :  { %v470_v1 = vld [vmem:[#allocation2 + $0x8] sm:$0xff] }
 0x4bf   :  { %v475_v57 = vpack.c.bf16 %v470_v1, %v469_v62 }
 0x4c1   :  { %1611 = vmatmul.msk.bf16.vlgmr.msra.gmra.mxu0 %vm73_vm0, %v475_v57 }
 0x53e   :  { %v504_v3 = vpop.f32.mrf.mxu0 }
 0x53f   :  { %v505_v4 = vadd.f32 %v1775_v2, %v504_v3 }
 0x541   :  { %v509_v5 = vadd.f32 %v505_v4, %v2023_v49 }
 0x543   :  { %v513_v6 = vsel %vm73_vm0, %v509_v5, 0.0 }
 0x544   :  { %514 = vadd.xlane.f32.xlu2 %v513_v6 }
 0x546   :  { %v506_v7 = vpop.f32.mrf.mxu0 }
 0x547   :  { %v507_v8 = vadd.f32 %v1775_v2, %v506_v7 }
 0x549   :  { %v510_v11 = vadd.f32 %v507_v8, %v2025_v50  ;;  %v1745_v50 = vld [vmem:[%s2412_s10 + $0x8] sm:$0xff] }
 0x54a   :  { %597 = vmatpush.bf16.msra.mxu1 %v1745_v50 }
 0x54b   :  { %v516_v12 = vsel %vm73_vm0, %v510_v11, 0.0 }
 0x54c   :  { %517 = vadd.xlane.f32.xlu0 %v516_v12  ;;  %v1749_v12 = vld [vmem:[%s2414_s12 + $0x18] sm:$0xff] }
 0x54d   :  { %738 = vmatpush.bf16.msra.mxu2 %v1749_v12 }
 0x54e   :  { %598 = vmatpush.bf16.msra.mxu1 %v1744_v25 }
 0x5b7   :  { %v515_v13 = vpop.xlane.xlu2 %514 }
 0x5b8   :  { %v519_v14 = vmul.f32 %v515_v13, %v2003_v10 }
 0x5ba   :  { %v521_v16 = vsub.f32 %v509_v5, %v519_v14 }
 0x5bc   :  { %v523_v17 = vmul.f32 %v521_v16, %v521_v16 }
 0x5be   :  { %v525_v18 = vsel %vm73_vm0, %v523_v17, 0.0 }
 0x5bf   :  { %v518_v19 = vpop.xlane.xlu0 %517  ;;  %526 = vadd.xlane.f32.xlu1 %v525_v18 }
 0x5c0   :  { %v520_v49 = vmul.f32 %v518_v19, %v2003_v10 }
 0x5c2   :  { %v522_v20 = vsub.f32 %v510_v11, %v520_v49 }
 0x5c4   :  { %v524_v21 = vmul.f32 %v522_v20, %v522_v20 }
 0x5c6   :  { %v528_v22 = vsel %vm73_vm0, %v524_v21, 0.0 }
 0x5c7   :  { %529 = vadd.xlane.f32.xlu2 %v528_v22 }
 0x632   :  { %v527_v23 = vpop.xlane.xlu1 %526 }
 0x633   :  { %v531_v24 = vmul.f32 %v527_v23, %v2003_v10 }
 0x635   :  { %v533_v26 = vadd.f32 1e-12, %v531_v24 }
 0x637   :  { %1814 = vrsqrt.f32 %v533_v26  ;;  %vm541_vm2 = vweird.f32 %v533_v26 }
 0x63a   :  { %v530_v27 = vpop.xlane.xlu2 %529 }
 0x63b   :  { %v532_v28 = vmul.f32 %v530_v27, %v2003_v10  ;;  %v1747_v27 = vld [vmem:[%s2414_s12 + $0x8] sm:$0xff] }
 0x63d   :  { %v1815_v29 = vpop.eup %1814  ;;  %v534_v30 = vadd.f32 1e-12, %v532_v28 }
 0x63e   :  { %v536_v31 = vmul.f32 %v1815_v29, %v533_v26  ;;  %vm542_vm1 = vweird.f32 %v1815_v29 }
 0x63f   :  { %1816 = vrsqrt.f32 %v534_v30  ;;  %vm543_vm3 = vmor %vm541_vm2, %vm542_vm1  ;;  %vm551_vm5 = vweird.f32 %v534_v30 }
 0x640   :  { %v537_v32 = vmul.f32 %v1815_v29, %v536_v31 }
 0x642   :  { %v538_v33 = vmul.f32 0.5, %v537_v32 }
 0x644   :  { %v539_v34 = vsub.f32 1.5, %v538_v33  ;;  %v1746_v33 = vld [vmem:[%s2414_s12] sm:$0xff] }
 0x645   :  { %v1817_v35 = vpop.eup %1816 }
 0x646   :  { %v540_v36 = vmul.f32 %v1815_v29, %v539_v34  ;;  %v546_v38 = vmul.f32 %v1817_v35, %v534_v30  ;;  %vm552_vm4 = vweird.f32 %v1817_v35 }
 0x647   :  { %vm553_vm6 = vmor %vm551_vm5, %vm552_vm4  ;;  %vm730_vm4 = vcmask 523264  }
 0x648   :  { %v547_v39 = vmul.f32 %v1817_v35, %v546_v38  ;;  %v544_v40 = vsel %vm543_vm3, %v1815_v29, %v540_v36 }
 0x649   :  { %v555_v43 = vmul.f32 %v544_v40, %v521_v16 }
 0x64a   :  { %v548_v41 = vmul.f32 0.5, %v547_v39 }
 0x64b   :  { %v560_v48 = vmul.f32 %v1776_v44, %v555_v43 }
 0x64c   :  { %v549_v42 = vsub.f32 1.5, %v548_v41 }
 0x64d   :  { %v2145_v53 = vadd.f32 %v1777_v47, %v560_v48 }
 0x64e   :  { %v550_v37 = vmul.f32 %v1817_v35, %v549_v42 }
 0x650   :  { %v554_v45 = vsel %vm553_vm6, %v1817_v35, %v550_v37 }
 0x651   :  { %v556_v51 = vmul.f32 %v554_v45, %v522_v20  ;;  %v1748_v20 = vld [vmem:[%s2414_s12 + $0x10] sm:$0xff] }
 0x652   :  { %739 = vmatpush.bf16.msra.mxu2 %v1748_v20 }
 0x653   :  { %v561_v52 = vmul.f32 %v1776_v44, %v556_v51 }
 0x655   :  { %v2147_v54 = vadd.f32 %v1777_v47, %v561_v52 }
 0x656   :  { %740 = vmatpush.bf16.msra.mxu2 %v1747_v27 }
 0x657   :  { %v571_v55 = vpack.c.bf16 %v2147_v54, %v2145_v53 }
 0x659   :  { %1620 = vmatmul.msk.bf16.vlgmr.msra.gmra.mxu1 %vm73_vm0, %v571_v55 }
 0x65a   :  { %741 = vmatpush.bf16.msra.mxu2 %v1746_v33 }
 0x6d6   :  { %v600_v58 = vpop.f32.mrf.mxu1 }
 0x6d7   :  { %v2155_v59 = vadd.f32 %v1778_v56, %v600_v58 }
 0x6d9   :  { %v2158_v46 = vmul.f32 0.70710677, %v2155_v59 }
 0x6db   :  { %v609_v60 = vmul.f32 %v2158_v46, %v2158_v46 }
 0x6dd   :  { %v610_v61 = vmin.f32 %v609_v60, 16.0 }
 0x6de   :  { %v602_v63 = vpop.f32.mrf.mxu1 }
 0x6df   :  { %v611_v0 = vmul.f32 2.1237322e-06, %v610_v61  ;;  %v622_v62 = vmul.f32 3.8918573e-05, %v610_v61  ;;  %v2162_v1 = vadd.f32 %v1778_v56, %v602_v63 }
 0x6e1   :  { %v612_v57 = vadd.f32 0.00028619796, %v611_v0  ;;  %v623_v2 = vadd.f32 0.001143296, %v622_v62  ;;  %v2165_v3 = vmul.f32 0.70710677, %v2162_v1 }
 0x6e2   :  { %v606_v20 = vmul.f32 0.5, %v2162_v1 }
 0x6e3   :  { %v624_v4 = vmul.f32 %v623_v2, %v610_v61  ;;  %v649_v5 = vmul.f32 %v2165_v3, %v2165_v3  ;;  %v613_v6 = vmul.f32 %v612_v57, %v610_v61 }
 0x6e5   :  { %v625_v7 = vadd.f32 0.014752088, %v624_v4  ;;  %v650_v8 = vmin.f32 %v649_v5, 16.0  ;;  %v614_v16 = vadd.f32 0.0036580483, %v613_v6 }
 0x6e7   :  { %v626_v11 = vmul.f32 %v625_v7, %v610_v61  ;;  %v651_v13 = vmul.f32 2.1237322e-06, %v650_v8  ;;  %v662_v14 = vmul.f32 3.8918573e-05, %v650_v8  ;;  %v615_v50 = vmul.f32 %v614_v16, %v610_v61 }
 0x6e9   :  { %v627_v17 = vadd.f32 0.112945676, %v626_v11  ;;  %v652_v18 = vadd.f32 0.00028619796, %v651_v13  ;;  %v663_v19 = vadd.f32 0.001143296, %v662_v14 }
 0x6ea   :  { %v616_v29 = vadd.f32 0.05243302, %v615_v50 }
 0x6eb   :  { %v628_v49 = vmul.f32 %v627_v17, %v610_v61  ;;  %v653_v21 = vmul.f32 %v652_v18, %v650_v8  ;;  %v664_v22 = vmul.f32 %v663_v19, %v650_v8 }
 0x6ec   :  { %v617_v35 = vmul.f32 %v616_v29, %v610_v61 }
 0x6ed   :  { %v629_v23 = vadd.f32 0.4994258, %v628_v49  ;;  %v654_v24 = vadd.f32 0.0036580483, %v653_v21  ;;  %v665_v25 = vadd.f32 0.014752088, %v664_v22 }
 0x6ee   :  { %v618_v41 = vadd.f32 0.18741608, %v617_v35  ;;  %v605_v49 = vmul.f32 0.5, %v2155_v59 }
 0x6ef   :  { %v630_v26 = vmul.f32 %v629_v23, %v610_v61  ;;  %v666_v28 = vmul.f32 %v665_v25, %v650_v8  ;;  %v655_v31 = vmul.f32 %v654_v24, %v650_v8 }
 0x6f0   :  { %v619_v45 = vmul.f32 %v618_v41, %v610_v61 }
 0x6f1   :  { %v631_v30 = vadd.f32 1.0, %v630_v26  ;;  %v667_v32 = vadd.f32 0.112945676, %v666_v28  ;;  %v656_v36 = vadd.f32 0.05243302, %v655_v31 }
 0x6f2   :  { %v620_v56 = vadd.f32 1.1283791, %v619_v45 }
 0x6f3   :  { %1818 = vrcp.f32 %v631_v30  ;;  %v668_v34 = vmul.f32 %v667_v32, %v650_v8  ;;  %v657_v44 = vmul.f32 %v656_v36, %v650_v8  ;;  %v643_v48 = vand.u32 2147483648, %v631_v30 }
 0x6f4   :  { %v641_v52 = vand.u32 2147483647, %v631_v30  ;;  %vm637_vm11 = vweird.f32 %v631_v30  ;;  %v621_v2 = vmul.f32 %v620_v56, %v2158_v46 }
 0x6f5   :  { %v669_v38 = vadd.f32 0.4994258, %v668_v34  ;;  %v658_v51 = vadd.f32 0.18741608, %v657_v44  ;;  %v644_v63 = vor.u32 1.1754944e-38, %v643_v48  ;;  %v1750_v44 = vld [vmem:[%s2432_s26 + $0x10] sm:$0xff] }
 0x6f6   :  { %vm642_vm13 = vcmp.eq.f32.partialorder %v641_v52, 8.507059e+37 }
 0x6f7   :  { %v670_v39 = vmul.f32 %v669_v38, %v650_v8  ;;  %v659_v0 = vmul.f32 %v658_v51, %v650_v8 }
 0x6f9   :  { %v1819_v40 = vpop.eup %1818  ;;  %v671_v43 = vadd.f32 1.0, %v670_v39  ;;  %v660_v61 = vadd.f32 1.1283791, %v659_v0 }
 0x6fa   :  { %v633_v42 = vmul.f32 %v1819_v40, %v631_v30  ;;  %vm638_vm7 = vweird.f32 %v1819_v40 }
 0x6fb   :  { %1820 = vrcp.f32 %v671_v43  ;;  %vm639_vm12 = vmor %vm637_vm11, %vm638_vm7  ;;  %v683_v5 = vand.u32 2147483648, %v671_v43  ;;  %v681_v11 = vand.u32 2147483647, %v671_v43  ;;  %vm677_vm1 = vweird.f32 %v671_v43 }
 0x6fc   :  { %v634_v37 = vsub.f32 1.0, %v633_v42  ;;  %v661_v16 = vmul.f32 %v660_v61, %v2165_v3  ;;  %v1779_v3 = vld [vmem:[%s2415_s13] ss:$0 sm:$0xff] }
 0x6fd   :  { %v684_v13 = vor.u32 1.1754944e-38, %v683_v5  ;;  %vm682_vm3 = vcmp.eq.f32.partialorder %v681_v11, 8.507059e+37 }
 0x6fe   :  { %v635_v47 = vmul.f32 %v1819_v40, %v634_v37 }
 0x700   :  { %v636_v55 = vadd.f32 %v1819_v40, %v635_v47 }
 0x701   :  { %v1821_v58 = vpop.eup %1820 }
 0x702   :  { %v640_v60 = vsel %vm639_vm12, %v1819_v40, %v636_v55  ;;  %v673_v62 = vmul.f32 %v1821_v58, %v671_v43  ;;  %vm678_vm14 = vweird.f32 %v1821_v58 }
 0x703   :  { %v645_v57 = vsel %vm642_vm13, %v644_v63, %v640_v60  ;;  %vm679_vm2 = vmor %vm677_vm1, %vm678_vm14 }
 0x704   :  { %v674_v4 = vsub.f32 1.0, %v673_v62  ;;  %v646_v6 = vmul.f32 %v645_v57, %v621_v2  ;;  %v1780_v2 = vld [vmem:[%s2416_s14] ss:$0 sm:$0xff] }
 0x706   :  { %v675_v7 = vmul.f32 %v1821_v58, %v674_v4  ;;  %v1621_v14 = vclamps-f32 %v646_v6, 1.0  ;;  %v1781_v6 = vld [vmem:[%s2417_s15] ss:$0 sm:$0xff] }
 0x708   :  { %v676_v12 = vadd.f32 %v1821_v58, %v675_v7  ;;  %v689_v19 = vadd.f32 1.0, %v1621_v14 }
 0x70a   :  { %v680_v8 = vsel %vm679_vm2, %v1821_v58, %v676_v12  ;;  %v691_v22 = vmul.f32 %v689_v19, %v605_v49 }
 0x70b   :  { %v685_v17 = vsel %vm682_vm3, %v684_v13, %v680_v8  ;;  %v1782_v8 = vld [vmem:[%s2407_s5 + $0x1] ss:$0 sm:$0xff] }
 0x70c   :  { %v686_v18 = vmul.f32 %v685_v17, %v661_v16 }
 0x70e   :  { %v1622_v46 = vclamps-f32 %v686_v18, 1.0 }
 0x710   :  { %v690_v21 = vadd.f32 1.0, %v1622_v46 }
 0x712   :  { %v692_v50 = vmul.f32 %v690_v21, %v606_v20 }
 0x714   :  { %v701_v23 = vpack.c.bf16 %v692_v50, %v691_v22 }
 0x716   :  { %1639 = vmatmul.msk.bf16.vlgmr.msra.gmra.mxu2 %vm730_vm4, %v701_v23 }
 0x799   :  { %v743_v24 = vpop.f32.mrf.mxu2 }
 0x79a   :  { %v744_v25 = vadd.f32 %v1779_v3, %v743_v24 }
 0x79c   :  { %v748_v26 = vadd.f32 %v744_v25, %v2145_v53 }
 0x79e   :  { %v752_v27 = vsel %vm73_vm0, %v748_v26, 0.0 }
 0x79f   :  { %753 = vadd.xlane.f32.xlu0 %v752_v27 }
 0x7a1   :  { %v745_v59 = vpop.f32.mrf.mxu2 }
 0x7a2   :  { %v746_v1 = vadd.f32 %v1779_v3, %v745_v59 }
 0x7a4   :  { %v749_v28 = vadd.f32 %v746_v1, %v2147_v54  ;;  %v1751_v54 = vld [vmem:[%s2432_s26 + $0x18] sm:$0xff] }
 0x7a5   :  { %838 = vmatpush.bf16.msrb.mxu3 %v1751_v54 }
 0x7a6   :  { %v755_v29 = vsel %vm73_vm0, %v749_v28, 0.0 }
 0x7a7   :  { %756 = vadd.xlane.f32.xlu1 %v755_v29 }
 0x7a9   :  { %839 = vmatpush.bf16.msrb.mxu3 %v1750_v44 }
 0x812   :  { %v754_v30 = vpop.xlane.xlu0 %753 }
 0x813   :  { %v758_v31 = vmul.f32 %v754_v30, %v2003_v10 }
 0x815   :  { %v760_v32 = vsub.f32 %v748_v26, %v758_v31 }
 0x817   :  { %v762_v33 = vmul.f32 %v760_v32, %v760_v32 }
 0x819   :  { %v764_v34 = vsel %vm73_vm0, %v762_v33, 0.0 }
 0x81a   :  { %v757_v35 = vpop.xlane.xlu1 %756  ;;  %765 = vadd.xlane.f32.xlu2 %v764_v34 }
 0x81b   :  { %v759_v53 = vmul.f32 %v757_v35, %v2003_v10 }
 0x81d   :  { %v761_v36 = vsub.f32 %v749_v28, %v759_v53 }
 0x81f   :  { %v763_v38 = vmul.f32 %v761_v36, %v761_v36 }
 0x821   :  { %v767_v39 = vsel %vm73_vm0, %v763_v38, 0.0 }
 0x822   :  { %768 = vadd.xlane.f32.xlu0 %v767_v39 }
 0x88d   :  { %v766_v40 = vpop.xlane.xlu2 %765 }
 0x88e   :  { %v770_v41 = vmul.f32 %v766_v40, %v2003_v10 }
 0x890   :  { %v772_v42 = vadd.f32 1e-12, %v770_v41 }
 0x892   :  { %1822 = vrsqrt.f32 %v772_v42  ;;  %vm780_vm6 = vweird.f32 %v772_v42 }
 0x895   :  { %v769_v43 = vpop.xlane.xlu0 %768 }
 0x896   :  { %v771_v37 = vmul.f32 %v769_v43, %v2003_v10 }
 0x898   :  { %v1823_v45 = vpop.eup %1822  ;;  %v773_v47 = vadd.f32 1e-12, %v771_v37 }
 0x899   :  { %v775_v48 = vmul.f32 %v1823_v45, %v772_v42  ;;  %vm781_vm5 = vweird.f32 %v1823_v45 }
 0x89a   :  { %1824 = vrsqrt.f32 %v773_v47  ;;  %vm782_vm7 = vmor %vm780_vm6, %vm781_vm5  ;;  %vm790_vm12 = vweird.f32 %v773_v47 }
 0x89b   :  { %v776_v51 = vmul.f32 %v1823_v45, %v775_v48 }
 0x89d   :  { %v777_v52 = vmul.f32 0.5, %v776_v51 }
 0x89f   :  { %v778_v55 = vsub.f32 1.5, %v777_v52 }
 0x8a0   :  { %v1825_v56 = vpop.eup %1824 }
 0x8a1   :  { %v779_v58 = vmul.f32 %v1823_v45, %v778_v55  ;;  %v785_v60 = vmul.f32 %v1825_v56, %v773_v47  ;;  %vm791_vm11 = vweird.f32 %v1825_v56 }
 0x8a2   :  { %vm792_vm13 = vmor %vm790_vm12, %vm791_vm11 }
 0x8a3   :  { %v786_v63 = vmul.f32 %v1825_v56, %v785_v60  ;;  %v783_v0 = vsel %vm782_vm7, %v1823_v45, %v779_v58 }
 0x8a4   :  { %v794_v4 = vmul.f32 %v783_v0, %v760_v32 }
 0x8a5   :  { %v787_v62 = vmul.f32 0.5, %v786_v63 }
 0x8a6   :  { %v799_v7 = vmul.f32 %v1780_v2, %v794_v4 }
 0x8a7   :  { %v788_v57 = vsub.f32 1.5, %v787_v62 }
 0x8a8   :  { %v2211_v13 = vadd.f32 %v1781_v6, %v799_v7 }
 0x8a9   :  { %v789_v61 = vmul.f32 %v1825_v56, %v788_v57 }
 0x8ab   :  { %v793_v5 = vsel %vm792_vm13, %v1825_v56, %v789_v61 }
 0x8ac   :  { %v795_v11 = vmul.f32 %v793_v5, %v761_v36 }
 0x8ae   :  { %v800_v12 = vmul.f32 %v1780_v2, %v795_v11 }
 0x8b0   :  { %v2213_v14 = vadd.f32 %v1781_v6, %v800_v12 }
 0x8b2   :  { %v811_v16 = vpack.c.bf16 %v2213_v14, %v2211_v13 }
 0x8b4   :  { %1653 = vmatmul.msk.bf16.vlgmr.msrb.gmra.mxu3 %vm73_vm0, %v811_v16 }
 0x937   :  { %v841_v17 = vpop.f32.mrf.mxu3 }
 0x938   :  { %v842_v18 = vadd.f32 %v1782_v8, %v841_v17 }
 0x93a   :  { %v846_v19 = vpack.c.bf16 %v842_v18, %v842_v18 }
 0x93c   :  { %v849_v46 = vunpack.c.l.b16 %v846_v19 }
 0x93e   :  { %v2221_v49 = vpack.c.b16 %v849_v46, %v849_v46 }
 0x93f   :  { %v843_v20 = vpop.f32.mrf.mxu3 }
 0x940   :  { %v844_v21 = vadd.f32 %v1782_v8, %v843_v20  ;;  %992 = vrot.lane.b32.xlu0 %v2221_v49, %s1883_s24  ;;  %851 = vrot.lane.b32.xlu1 %v2221_v49, %s1884_s2 }
 0x942   :  { %v847_v22 = vpack.c.bf16 %v844_v21, %v844_v21 }
 0x944   :  { %v873_v50 = vunpack.c.l.b16 %v847_v22 }
 0x946   :  { %v2227_v23 = vpack.c.b16 %v873_v50, %v873_v50 }
 0x948   :  { %875 = vrot.lane.b32.xlu2 %v2227_v23, %s1884_s2  ;;  %990 = vrot.lane.b32.xlu0 %v2221_v49, %s1885_s25 }
 0x949   :  { %1015 = vrot.lane.b32.xlu1 %v2227_v23, %s1883_s24 }
 0x950   :  { %1013 = vrot.lane.b32.xlu2 %v2227_v23, %s1885_s25 }
 0x9a2   :  { %v876_v3 = vpop.permute.xlu2 %875 }
 0x9a3   :  { %v881_v24 = vsel %vm180_vm8, %v876_v3, 0 }
 0x9a4   :  { %890 = vmatpush.bf16.xpose.msrb.mxu1 %v881_v24 }
 0x9aa   :  { %v1014_v29 = vpop.permute.xlu2 %1013 }
 0x9ab   :  { %1655 = vmatmul.msk.bf16.vlgmr.msrb.gmra.mxu1 %vm180_vm8, %v847_v22 }
 0x9b2   :  { %v993_v25 = vpop.permute.xlu0 %992  ;;  %v852_v26 = vpop.permute.xlu1 %851 }
 0x9b3   :  { %v998_v27 = vsel %vm180_vm8, %v993_v25, 0  ;;  %v857_v59 = vsel %vm180_vm8, %v852_v26, 0 }
 0x9b4   :  { %866 = vmatpush.bf16.xpose.msrb.mxu0 %v857_v59 }
 0x9ba   :  { %v991_v30 = vpop.permute.xlu0 %990 }
 0x9bb   :  { %v1016_v1 = vpop.permute.xlu1 %1015  ;;  %1654 = vmatmul.msk.bf16.vlgmr.msrb.gmra.mxu0 %vm180_vm8, %v846_v19 }
 0x9bc   :  { %1007 = vmatpush.bf16.xpose.msra.mxu0 %v998_v27  ;;  %v1021_v28 = vsel %vm180_vm8, %v1016_v1, 0 }
 0x9bd   :  { %1030 = vmatpush.bf16.xpose.msra.mxu1 %v1021_v28 }
 0x9c4   :  { %1659 = vmatmul.msk.bf16.vlgmr.msra.gmra.mxu1 %vm180_vm8, %v1014_v29 }
 0x9cb   :  { %1658 = vmatmul.msk.bf16.vlgmr.msra.gmra.mxu0 %vm180_vm8, %v991_v30 }
 0xa28   :  { %v892_v31 = vpop.f32.mrf.mxu1 }
 0xa29   :  { %v893_v32 = vadd.f32 %v892_v31, %v2067_v15 }
 0xa2b   :  { %v899_v33 = vsel %vm224_vm9, %v893_v32, -inf }
 0xa2c   :  { %900 = vmax.xlane.f32.xlu0 %v899_v33 }
 0xa30   :  { %v894_v34 = vpop.f32.mrf.mxu1 }
 0xa38   :  { %v868_v35 = vpop.f32.mrf.mxu0 }
 0xa39   :  { %v869_v53 = vadd.f32 %v868_v35, %v2060_v9 }
 0xa3b   :  { %v896_v36 = vsel %vm224_vm9, %v869_v53, -inf }
 0xa3c   :  { %897 = vmax.xlane.f32.xlu1 %v896_v36 }
 0xa40   :  { %v870_v38 = vpop.f32.mrf.mxu0 }
 0xa41   :  { %v1032_v39 = vpop.f32.mrf.mxu1 }
 0xa42   :  { %v1033_v54 = vadd.f32 %v1032_v39, %v2067_v15 }
 0xa44   :  { %v1039_v40 = vsel %vm224_vm9, %v1033_v54, -inf }
 0xa45   :  { %1040 = vmax.xlane.f32.xlu1 %v1039_v40 }
 0xa48   :  { %v1009_v41 = vpop.f32.mrf.mxu0 }
 0xa49   :  { %v1010_v42 = vadd.f32 %v1009_v41, %v2060_v9  ;;  %v1034_v44 = vpop.f32.mrf.mxu1 }
 0xa4b   :  { %v1036_v43 = vsel %vm224_vm9, %v1010_v42, -inf }
 0xa4c   :  { %1037 = vmax.xlane.f32.xlu2 %v1036_v43 }
 0xa50   :  { %v1011_v37 = vpop.f32.mrf.mxu0 }
 0xa64   :  { %946 = vrot.lane.b32.xlu2 %v2221_v49, %s1886_s30 }
 0xa9f   :  { %v901_v45 = vpop.xlane.xlu0 %900 }
 0xaa0   :  { %v903_v47 = vsub.f32 %v893_v32, %v901_v45 }
 0xaa2   :  { %v906_v48 = vmul.f32 1.442695, %v903_v47 }
 0xaa4   :  { %1826 = vpow2.f32 %v906_v48 }
 0xaaa   :  { %v2255_v51 = vpop.eup %1826 }
 0xaab   :  { %v911_v15 = vsel %vm224_vm9, %v2255_v51, 0.0 }
 0xaac   :  { %912 = vadd.xlane.f32.xlu2 %v911_v15 }
 0xaaf   :  { %v898_v52 = vpop.xlane.xlu1 %897 }
 0xab0   :  { %v902_v9 = vsub.f32 %v869_v53, %v898_v52 }
 0xab2   :  { %v904_v55 = vmul.f32 1.442695, %v902_v9 }
 0xab4   :  { %1828 = vpow2.f32 %v904_v55 }
 0xab8   :  { %v1041_v56 = vpop.xlane.xlu1 %1040 }
 0xab9   :  { %v1043_v58 = vsub.f32 %v1033_v54, %v1041_v56 }
 0xaba   :  { %v1829_v60 = vpop.eup %1828 }
 0xabb   :  { %v1046_v63 = vmul.f32 1.442695, %v1043_v58  ;;  %v908_v0 = vsel %vm224_vm9, %v1829_v60, 0.0 }
 0xabc   :  { %909 = vadd.xlane.f32.xlu0 %v908_v0 }
 0xabd   :  { %1830 = vpow2.f32 %v1046_v63 }
 0xabf   :  { %v1038_v62 = vpop.xlane.xlu2 %1037 }
 0xac0   :  { %v1042_v57 = vsub.f32 %v1010_v42, %v1038_v62 }
 0xac2   :  { %v1044_v2 = vmul.f32 1.442695, %v1042_v57 }
 0xac3   :  { %v2260_v4 = vpop.eup %1830 }
 0xac4   :  { %1832 = vpow2.f32 %v1044_v2  ;;  %1107 = vrot.lane.b32.xlu2 %v2227_v23, %s1887_s0  ;;  %v1051_v61 = vsel %vm224_vm9, %v2260_v4, 0.0 }
 0xac5   :  { %1052 = vadd.xlane.f32.xlu0 %v1051_v61 }
 0xac7   :  { %v947_v5 = vpop.permute.xlu2 %946 }
 0xac8   :  { %v952_v6 = vsel %vm280_vm10, %v947_v5, 0 }
 0xac9   :  { %961 = vmatpush.bf16.msrb.mxu2 %v952_v6 }
 0xaca   :  { %v1833_v7 = vpop.eup %1832 }
 0xacb   :  { %v1048_v11 = vsel %vm224_vm9, %v1833_v7, 0.0 }
 0xacc   :  { %1049 = vadd.xlane.f32.xlu1 %v1048_v11 }
 0xad9   :  { %1086 = vrot.lane.b32.xlu0 %v2221_v49, %s1887_s0 }
 0xae5   :  { %967 = vrot.lane.b32.xlu1 %v2227_v23, %s1886_s30 }
 0xb1f   :  { %v913_v16 = vpop.xlane.xlu2 %912 }
 0xb20   :  { %v939_v38 = vand.u32 2147483648, %v913_v16  ;;  %vm933_vm11 = vweird.f32 %v913_v16  ;;  %v937_v54 = vand.u32 2147483647, %v913_v16 }
 0xb22   :  { %v940_v37 = vor.u32 1.1754944e-38, %v939_v38  ;;  %v1755_v38 = vld [vmem:[%s2412_s10 + $0x18] sm:$0xff] }
 0xb23   :  { %1272 = vmatpush.bf16.msrb.mxu1 %v1755_v38 }
 0xb27   :  { %v1108_v9 = vpop.permute.xlu2 %1107 }
 0xb2f   :  { %v910_v12 = vpop.xlane.xlu0 %909 }
 0xb30   :  { %1834 = vrcp.f32 %v910_v12  ;;  %v925_v19 = vand.u32 2147483648, %v910_v12  ;;  %v923_v20 = vand.u32 2147483647, %v910_v12  ;;  %vm919_vm1 = vweird.f32 %v910_v12 }
 0xb31   :  { %1836 = vrcp.f32 %v913_v16 }
 0xb32   :  { %v926_v50 = vor.u32 1.1754944e-38, %v925_v19  ;;  %vm924_vm3 = vcmp.eq.f32.partialorder %v923_v20, 8.507059e+37 }
 0xb36   :  { %v1835_v8 = vpop.eup %1834 }
 0xb37   :  { %v915_v17 = vmul.f32 %v1835_v8, %v910_v12  ;;  %vm920_vm14 = vweird.f32 %v1835_v8  ;;  %v1837_v21 = vpop.eup %1836 }
 0xb38   :  { %vm921_vm2 = vmor %vm919_vm1, %vm920_vm14  ;;  %v929_v23 = vmul.f32 %v1837_v21, %v913_v16  ;;  %v1053_v26 = vpop.xlane.xlu0 %1052  ;;  %vm934_vm6 = vweird.f32 %v1837_v21  ;;  %vm938_vm1 = vcmp.eq.f32.partialorder %v937_v54, 8.507059e+37 }
 0xb39   :  { %v916_v18 = vsub.f32 1.0, %v915_v17  ;;  %vm935_vm13 = vmor %vm933_vm11, %vm934_vm6  ;;  %v1079_v62 = vand.u32 2147483648, %v1053_v26  ;;  %v1077_v57 = vand.u32 2147483647, %v1053_v26 }
 0xb3a   :  { %v930_v59 = vsub.f32 1.0, %v929_v23 }
 0xb3b   :  { %v917_v46 = vmul.f32 %v1835_v8, %v916_v18  ;;  %vm1078_vm6 = vcmp.eq.f32.partialorder %v1077_v57, 8.507059e+37 }
 0xb3c   :  { %v931_v29 = vmul.f32 %v1837_v21, %v930_v59 }
 0xb3d   :  { %v918_v22 = vadd.f32 %v1835_v8, %v917_v46  ;;  %v1752_v46 = vld [vmem:[%s2408_s6 + $0x10] sm:$0xff] }
 0xb3e   :  { %v932_v35 = vadd.f32 %v1837_v21, %v931_v29 }
 0xb3f   :  { %v922_v49 = vsel %vm921_vm2, %v1835_v8, %v918_v22  ;;  %v1050_v3 = vpop.xlane.xlu1 %1049 }
 0xb40   :  { %v927_v24 = vsel %vm924_vm3, %v926_v50, %v922_v49  ;;  %1838 = vrcp.f32 %v1050_v3  ;;  %v1065_v31 = vand.u32 2147483648, %v1050_v3  ;;  %v1063_v33 = vand.u32 2147483647, %v1050_v3 }
 0xb41   :  { %v942_v25 = vmul.f32 %v1829_v60, %v927_v24  ;;  %1840 = vrcp.f32 %v1053_v26  ;;  %vm1059_vm7 = vweird.f32 %v1050_v3  ;;  %v936_v42 = vsel %vm935_vm13, %v1837_v21, %v932_v35 }
 0xb42   :  { %v1066_v40 = vor.u32 1.1754944e-38, %v1065_v31  ;;  %vm1064_vm14 = vcmp.eq.f32.partialorder %v1063_v33, 8.507059e+37  ;;  %v941_v47 = vsel %vm938_vm1, %v940_v37, %v936_v42  ;;  %v1113_v60 = vsel %vm280_vm10, %v1108_v9, 0 }
 0xb43   :  { %v944_v27 = vpack.c.bf16 %v942_v25, %v942_v25  ;;  %v943_v52 = vmul.f32 %v2255_v51, %v941_v47  ;;  %vm1073_vm3 = vweird.f32 %v1053_v26  ;;  %v1080_v51 = vor.u32 1.1754944e-38, %v1079_v62 }
 0xb45   :  { %1656 = vmatmul.msk.bf16.vlgmr.msrb.gmra.mxu2 %vm224_vm9, %v944_v27  ;;  %v945_v63 = vpack.c.bf16 %v943_v52, %v943_v52 }
 0xb46   :  { %v1839_v1 = vpop.eup %1838 }
 0xb47   :  { %v1055_v28 = vmul.f32 %v1839_v1, %v1050_v3  ;;  %vm1060_vm5 = vweird.f32 %v1839_v1  ;;  %v1841_v36 = vpop.eup %1840  ;;  %v1783_v3 = vld [vmem:[%s2409_s7 + $0x1] ss:$0 sm:$0xff] }
 0xb48   :  { %vm1061_vm12 = vmor %vm1059_vm7, %vm1060_vm5  ;;  %v1069_v44 = vmul.f32 %v1841_v36, %v1053_v26  ;;  %vm1074_vm2 = vweird.f32 %v1841_v36 }
 0xb49   :  { %v1056_v30 = vsub.f32 1.0, %v1055_v28  ;;  %vm1075_vm5 = vmor %vm1073_vm3, %vm1074_vm2 }
 0xb4a   :  { %v1070_v15 = vsub.f32 1.0, %v1069_v44 }
 0xb4b   :  { %v1057_v32 = vmul.f32 %v1839_v1, %v1056_v30  ;;  %v1087_v34 = vpop.permute.xlu0 %1086 }
 0xb4c   :  { %v1092_v53 = vsel %vm280_vm10, %v1087_v34, 0  ;;  %v1071_v56 = vmul.f32 %v1841_v36, %v1070_v15 }
 0xb4d   :  { %v1058_v39 = vadd.f32 %v1839_v1, %v1057_v32  ;;  %1101 = vmatpush.bf16.msra.mxu2 %v1092_v53 }
 0xb4e   :  { %v1072_v0 = vadd.f32 %v1841_v36, %v1071_v56 }
 0xb4f   :  { %v1062_v41 = vsel %vm1061_vm12, %v1839_v1, %v1058_v39 }
 0xb50   :  { %v1067_v43 = vsel %vm1064_vm14, %v1066_v40, %v1062_v41  ;;  %v1076_v2 = vsel %vm1075_vm5, %v1841_v36, %v1072_v0  ;;  %v1754_v40 = vld [vmem:[%s2412_s10 + $0x10] sm:$0xff] }
 0xb51   :  { %v1082_v45 = vmul.f32 %v1833_v7, %v1067_v43  ;;  %v1081_v61 = vsel %vm1078_vm6, %v1080_v51, %v1076_v2  ;;  %1273 = vmatpush.bf16.msrb.mxu1 %v1754_v40  ;;  %v1785_v2 = vld [vmem:[%s2411_s9 + $0x1] ss:$0 sm:$0xff]  ;;  %s1575_s9 = sshll.u32 %s1889_s4, 4  ;;  %s1576_s9 = int_to_ptr.vmem [resolvable:$true] %s1575_s9 }
 0xb52   :  { %v1083_v5 = vmul.f32 %v2260_v4, %v1081_v61  ;;  %v1753_v4 = vld [vmem:[%s2408_s6 + $0x18] sm:$0xff] }
 0xb53   :  { %v1084_v48 = vpack.c.bf16 %v1082_v45, %v1082_v45  ;;  %1172 = vmatpush.bf16.msrb.mxu0 %v1753_v4 }
 0xb54   :  { %v1085_v6 = vpack.c.bf16 %v1083_v5, %v1083_v5 }
 0xb55   :  { %1660 = vmatmul.msk.bf16.vlgmr.msra.gmra.mxu2 %vm224_vm9, %v1084_v48 }
 0xb57   :  { %v968_v55 = vpop.permute.xlu1 %967  ;;  %1173 = vmatpush.bf16.msrb.mxu0 %v1752_v46 }
 0xb58   :  { %v973_v58 = vsel %vm280_vm10, %v968_v55, 0 }
 0xb59   :  { %982 = vmatpush.bf16.msra.mxu3 %v973_v58 }
 0xb5c   :  { %1657 = vmatmul.msk.bf16.vlgmr.msra.gmra.mxu3 %vm224_vm9, %v945_v63  ;;  %v1784_v63 = vld [vmem:[%s2410_s8 + $0x1] ss:$0 sm:$0xff] }
 0xb5d   :  { %1122 = vmatpush.bf16.msrb.mxu3 %v1113_v60 }
 0xb6c   :  { %1661 = vmatmul.msk.bf16.vlgmr.msrb.gmra.mxu3 %vm224_vm9, %v1085_v6 }
 0xbc8   :  { %v963_v7 = vpop.f32.mrf.mxu2 }
 0xbc9   :  { %988 = vst.msk [vmem:[#allocation2] sm:$0xff] %vm180_vm8, %v963_v7 }
 0xbd0   :  { %v965_v11 = vpop.f32.mrf.mxu2 }
 0xbd8   :  { %v1103_v12 = vpop.f32.mrf.mxu2 }
 0xbd9   :  { %1130 = vrot.lane.b32.xlu0 %v1103_v12, %s1888_s21  ;;  %v1786_v12 = vld [vmem:[%s2413_s11 + $0x1] ss:$0 sm:$0xff] }
 0xbdf   :  { %v984_v16 = vpop.f32.mrf.mxu3 }
 0xbe0   :  { %989 = vst.msk [vmem:[#allocation2 + $0x8] sm:$0xff] %vm180_vm8, %v984_v16  ;;  %v1105_v8 = vpop.f32.mrf.mxu2 }
 0xbe7   :  { %v986_v17 = vpop.f32.mrf.mxu3 }
 0xbef   :  { %v1124_v18 = vpop.f32.mrf.mxu3 }
 0xbf0   :  { %1132 = vrot.lane.b32.xlu1 %v1124_v18, %s1888_s21 }
 0xbf7   :  { %v1126_v19 = vpop.f32.mrf.mxu3 }
 0xc4b   :  { %v1131_v20 = vpop.permute.xlu0 %1130 }
 0xc4c   :  { %1136 = vst.msk [vmem:[#allocation2] sm:$0xff] %vm466_vm15, %v1131_v20 }
 0xc53   :  { %v1138_v22 = vld [vmem:[#allocation2] sm:$0xff] }
 0xc62   :  { %v1133_v21 = vpop.permute.xlu1 %1132 }
 0xc63   :  { %1137 = vst.msk [vmem:[#allocation2 + $0x8] sm:$0xff] %vm466_vm15, %v1133_v21 }
 0xc6a   :  { %v1139_v50 = vld [vmem:[#allocation2 + $0x8] sm:$0xff] }
 0xc6b   :  { %v1145_v49 = vpack.c.bf16 %v1139_v50, %v1138_v22 }
 0xc6d   :  { %1675 = vmatmul.msk.bf16.vlgmr.msrb.gmra.mxu0 %vm73_vm0, %v1145_v49 }
 0xcea   :  { %v1175_v23 = vpop.f32.mrf.mxu0 }
 0xceb   :  { %v1176_v24 = vadd.f32 %v1783_v3, %v1175_v23 }
 0xced   :  { %v1180_v25 = vadd.f32 %v1176_v24, %v2211_v13 }
 0xcef   :  { %v1186_v26 = vsel %vm73_vm0, %v1180_v25, 0.0 }
 0xcf0   :  { %1187 = vadd.xlane.f32.xlu2 %v1186_v26 }
 0xcf2   :  { %v1177_v27 = vpop.f32.mrf.mxu0 }
 0xcf3   :  { %v1178_v59 = vadd.f32 %v1783_v3, %v1177_v27 }
 0xcf5   :  { %v1181_v1 = vadd.f32 %v1178_v59, %v2213_v14  ;;  %v1759_v59 = vld [vmem:[%s2414_s12 + $0x38] sm:$0xff] }
 0xcf6   :  { %1414 = vmatpush.bf16.msrb.mxu2 %v1759_v59 }
 0xcf7   :  { %v1189_v28 = vsel %vm73_vm0, %v1181_v1, 0.0 }
 0xcf8   :  { %1190 = vadd.xlane.f32.xlu0 %v1189_v28 }
 0xd63   :  { %v1188_v29 = vpop.xlane.xlu2 %1187 }
 0xd64   :  { %v1192_v30 = vmul.f32 %v1188_v29, %v2003_v10 }
 0xd66   :  { %v1194_v31 = vsub.f32 %v1180_v25, %v1192_v30 }
 0xd68   :  { %v1196_v32 = vmul.f32 %v1194_v31, %v1194_v31 }
 0xd6a   :  { %v1198_v33 = vsel %vm73_vm0, %v1196_v32, 0.0 }
 0xd6b   :  { %v1191_v34 = vpop.xlane.xlu0 %1190  ;;  %1199 = vadd.xlane.f32.xlu1 %v1198_v33 }
 0xd6c   :  { %v1193_v13 = vmul.f32 %v1191_v34, %v2003_v10  ;;  %v1758_v34 = vld [vmem:[%s2414_s12 + $0x30] sm:$0xff] }
 0xd6d   :  { %1415 = vmatpush.bf16.msrb.mxu2 %v1758_v34 }
 0xd6e   :  { %v1195_v35 = vsub.f32 %v1181_v1, %v1193_v13 }
 0xd70   :  { %v1197_v53 = vmul.f32 %v1195_v35, %v1195_v35 }
 0xd72   :  { %v1201_v36 = vsel %vm73_vm0, %v1197_v53, 0.0 }
 0xd73   :  { %1202 = vadd.xlane.f32.xlu2 %v1201_v36 }
 0xdde   :  { %v1200_v14 = vpop.xlane.xlu1 %1199 }
 0xddf   :  { %v1204_v39 = vmul.f32 %v1200_v14, %v2003_v10 }
 0xde1   :  { %v1206_v54 = vadd.f32 1e-12, %v1204_v39 }
 0xde3   :  { %1842 = vrsqrt.f32 %v1206_v54  ;;  %vm1214_vm9 = vweird.f32 %v1206_v54 }
 0xde6   :  { %v1203_v41 = vpop.xlane.xlu2 %1202 }
 0xde7   :  { %v1205_v42 = vmul.f32 %v1203_v41, %v2003_v10 }
 0xde9   :  { %v1843_v44 = vpop.eup %1842  ;;  %v1207_v43 = vadd.f32 1e-12, %v1205_v42 }
 0xdea   :  { %v1209_v37 = vmul.f32 %v1843_v44, %v1206_v54  ;;  %vm1215_vm8 = vweird.f32 %v1843_v44  ;;  %v1757_v54 = vld [vmem:[%s2414_s12 + $0x28] sm:$0xff] }
 0xdeb   :  { %1844 = vrsqrt.f32 %v1207_v43  ;;  %vm1216_vm10 = vmor %vm1214_vm9, %vm1215_vm8  ;;  %vm1224_vm7 = vweird.f32 %v1207_v43  ;;  %1416 = vmatpush.bf16.msrb.mxu2 %v1757_v54 }
 0xdec   :  { %v1210_v45 = vmul.f32 %v1843_v44, %v1209_v37  ;;  %v1756_v37 = vld [vmem:[%s2414_s12 + $0x20] sm:$0xff] }
 0xdee   :  { %v1211_v47 = vmul.f32 0.5, %v1210_v45 }
 0xdef   :  { %1417 = vmatpush.bf16.msrb.mxu2 %v1756_v37 }
 0xdf0   :  { %v1212_v48 = vsub.f32 1.5, %v1211_v47 }
 0xdf1   :  { %v1845_v15 = vpop.eup %1844 }
 0xdf2   :  { %v1213_v52 = vmul.f32 %v1843_v44, %v1212_v48  ;;  %v1219_v9 = vmul.f32 %v1845_v15, %v1207_v43  ;;  %vm1225_vm15 = vweird.f32 %v1845_v15 }
 0xdf3   :  { %vm1226_vm11 = vmor %vm1224_vm7, %vm1225_vm15 }
 0xdf4   :  { %v1220_v55 = vmul.f32 %v1845_v15, %v1219_v9  ;;  %v1217_v56 = vsel %vm1216_vm10, %v1843_v44, %v1213_v52 }
 0xdf5   :  { %v1228_v0 = vmul.f32 %v1217_v56, %v1194_v31 }
 0xdf6   :  { %v1221_v58 = vmul.f32 0.5, %v1220_v55 }
 0xdf7   :  { %v1233_v51 = vmul.f32 %v1784_v63, %v1228_v0 }
 0xdf8   :  { %v1222_v60 = vsub.f32 1.5, %v1221_v58 }
 0xdf9   :  { %v2319_v6 = vadd.f32 %v1785_v2, %v1233_v51 }
 0xdfa   :  { %v1223_v62 = vmul.f32 %v1845_v15, %v1222_v60 }
 0xdfc   :  { %v1227_v57 = vsel %vm1226_vm11, %v1845_v15, %v1223_v62  ;;  %vm1499_vm11 = vcmask 1041409  }
 0xdfd   :  { %v1229_v61 = vmul.f32 %v1227_v57, %v1195_v35 }
 0xdff   :  { %v1234_v5 = vmul.f32 %v1784_v63, %v1229_v61 }
 0xe01   :  { %v2321_v7 = vadd.f32 %v1785_v2, %v1234_v5 }
 0xe03   :  { %v1245_v11 = vpack.c.bf16 %v2321_v7, %v2319_v6 }
 0xe05   :  { %1691 = vmatmul.msk.bf16.vlgmr.msrb.gmra.mxu1 %vm73_vm0, %v1245_v11 }
 0xe82   :  { %v1275_v16 = vpop.f32.mrf.mxu1 }
 0xe83   :  { %v2329_v8 = vadd.f32 %v1786_v12, %v1275_v16 }
 0xe85   :  { %v2332_v17 = vmul.f32 0.70710677, %v2329_v8 }
 0xe87   :  { %v1284_v18 = vmul.f32 %v2332_v17, %v2332_v17 }
 0xe89   :  { %v1285_v19 = vmin.f32 %v1284_v18, 16.0 }
 0xe8a   :  { %v1277_v4 = vpop.f32.mrf.mxu1 }
 0xe8b   :  { %v1286_v46 = vmul.f32 2.1237322e-06, %v1285_v19  ;;  %v1297_v20 = vmul.f32 3.8918573e-05, %v1285_v19  ;;  %v2336_v21 = vadd.f32 %v1786_v12, %v1277_v4 }
 0xe8d   :  { %v1287_v22 = vadd.f32 0.00028619796, %v1286_v46  ;;  %v1298_v50 = vadd.f32 0.001143296, %v1297_v20  ;;  %v2339_v49 = vmul.f32 0.70710677, %v2336_v21 }
 0xe8f   :  { %v1299_v3 = vmul.f32 %v1298_v50, %v1285_v19  ;;  %v1324_v23 = vmul.f32 %v2339_v49, %v2339_v49  ;;  %v1288_v24 = vmul.f32 %v1287_v22, %v1285_v19 }
 0xe91   :  { %v1300_v25 = vadd.f32 0.014752088, %v1299_v3  ;;  %v1325_v26 = vmin.f32 %v1324_v23, 16.0  ;;  %v1289_v29 = vadd.f32 0.0036580483, %v1288_v24 }
 0xe93   :  { %v1301_v27 = vmul.f32 %v1300_v25, %v1285_v19  ;;  %v1326_v1 = vmul.f32 2.1237322e-06, %v1325_v26  ;;  %v1337_v28 = vmul.f32 3.8918573e-05, %v1325_v26  ;;  %v1290_v53 = vmul.f32 %v1289_v29, %v1285_v19 }
 0xe95   :  { %v1302_v30 = vadd.f32 0.112945676, %v1301_v27  ;;  %v1327_v31 = vadd.f32 0.00028619796, %v1326_v1  ;;  %v1338_v32 = vadd.f32 0.001143296, %v1337_v28 }
 0xe96   :  { %v1291_v41 = vadd.f32 0.05243302, %v1290_v53 }
 0xe97   :  { %v1303_v33 = vmul.f32 %v1302_v30, %v1285_v19  ;;  %v1328_v13 = vmul.f32 %v1327_v31, %v1325_v26  ;;  %v1339_v35 = vmul.f32 %v1338_v32, %v1325_v26  ;;  %v1280_v31 = vmul.f32 0.5, %v2329_v8 }
 0xe98   :  { %v1292_v47 = vmul.f32 %v1291_v41, %v1285_v19  ;;  %v1281_v32 = vmul.f32 0.5, %v2336_v21 }
 0xe99   :  { %v1304_v36 = vadd.f32 0.4994258, %v1303_v33  ;;  %v1329_v14 = vadd.f32 0.0036580483, %v1328_v13  ;;  %v1340_v38 = vadd.f32 0.014752088, %v1339_v35 }
 0xe9a   :  { %v1293_v55 = vadd.f32 0.18741608, %v1292_v47 }
 0xe9b   :  { %v1305_v39 = vmul.f32 %v1304_v36, %v1285_v19  ;;  %v1341_v40 = vmul.f32 %v1340_v38, %v1325_v26  ;;  %v1330_v44 = vmul.f32 %v1329_v14, %v1325_v26 }
 0xe9c   :  { %v1294_v0 = vmul.f32 %v1293_v55, %v1285_v19 }
 0xe9d   :  { %v1306_v42 = vadd.f32 1.0, %v1305_v39  ;;  %v1342_v43 = vadd.f32 0.112945676, %v1341_v40  ;;  %v1331_v48 = vadd.f32 0.05243302, %v1330_v44 }
 0xe9e   :  { %v1295_v5 = vadd.f32 1.1283791, %v1294_v0 }
 0xe9f   :  { %1846 = vrcp.f32 %v1306_v42  ;;  %v1343_v45 = vmul.f32 %v1342_v43, %v1325_v26  ;;  %v1332_v58 = vmul.f32 %v1331_v48, %v1325_v26  ;;  %v1318_v57 = vand.u32 2147483648, %v1306_v42 }
 0xea0   :  { %v1316_v51 = vand.u32 2147483647, %v1306_v42  ;;  %vm1312_vm13 = vweird.f32 %v1306_v42  ;;  %v1296_v20 = vmul.f32 %v1295_v5, %v2332_v17 }
 0xea1   :  { %v1344_v15 = vadd.f32 0.4994258, %v1343_v45  ;;  %v1333_v2 = vadd.f32 0.18741608, %v1332_v58  ;;  %v1319_v16 = vor.u32 1.1754944e-38, %v1318_v57  ;;  %v1760_v58 = vld [vmem:[%s2418_s16] sm:$0xff] }
 0xea2   :  { %vm1317_vm1 = vcmp.eq.f32.partialorder %v1316_v51, 8.507059e+37 }
 0xea3   :  { %v1345_v52 = vmul.f32 %v1344_v15, %v1325_v26  ;;  %v1334_v18 = vmul.f32 %v1333_v2, %v1325_v26 }
 0xea5   :  { %v1847_v9 = vpop.eup %1846  ;;  %v1346_v60 = vadd.f32 1.0, %v1345_v52  ;;  %v1335_v19 = vadd.f32 1.1283791, %v1334_v18 }
 0xea6   :  { %v1308_v56 = vmul.f32 %v1847_v9, %v1306_v42  ;;  %vm1313_vm12 = vweird.f32 %v1847_v9 }
 0xea7   :  { %1848 = vrcp.f32 %v1346_v60  ;;  %vm1314_vm14 = vmor %vm1312_vm13, %vm1313_vm12  ;;  %v1358_v50 = vand.u32 2147483648, %v1346_v60  ;;  %v1356_v24 = vand.u32 2147483647, %v1346_v60  ;;  %vm1352_vm3 = vweird.f32 %v1346_v60 }
 0xea8   :  { %v1309_v63 = vsub.f32 1.0, %v1308_v56  ;;  %v1336_v1 = vmul.f32 %v1335_v19, %v2339_v49  ;;  %v1787_v49 = vld [vmem:[%s2415_s13 + $0x1] ss:$0 sm:$0xff]  ;;  %vm1568_vm12 = vcmask 17408  }
 0xea9   :  { %v1359_v27 = vor.u32 1.1754944e-38, %v1358_v50  ;;  %vm1357_vm6 = vcmp.eq.f32.partialorder %v1356_v24, 8.507059e+37 }
 0xeaa   :  { %v1310_v62 = vmul.f32 %v1847_v9, %v1309_v63 }
 0xeac   :  { %v1311_v61 = vadd.f32 %v1847_v9, %v1310_v62 }
 0xead   :  { %v1849_v11 = vpop.eup %1848 }
 0xeae   :  { %v1315_v12 = vsel %vm1314_vm14, %v1847_v9, %v1311_v61  ;;  %v1348_v4 = vmul.f32 %v1849_v11, %v1346_v60  ;;  %vm1353_vm2 = vweird.f32 %v1849_v11  ;;  %v1761_v9 = vld [vmem:[%s2418_s16 + $0x8] sm:$0xff] }
 0xeaf   :  { %v1320_v46 = vsel %vm1317_vm1, %v1319_v16, %v1315_v12  ;;  %vm1354_vm5 = vmor %vm1352_vm3, %vm1353_vm2  ;;  %1523 = vmatpush.bf16.msra.mxu3 %v1761_v9  ;;  %v1788_v16 = vld [vmem:[%s2416_s14 + $0x1] ss:$0 sm:$0xff] }
 0xeb0   :  { %v1349_v22 = vsub.f32 1.0, %v1348_v4  ;;  %v1321_v3 = vmul.f32 %v1320_v46, %v1296_v20  ;;  %v1789_v20 = vld [vmem:[%s2417_s15 + $0x1] ss:$0 sm:$0xff] }
 0xeb2   :  { %v1350_v23 = vmul.f32 %v1849_v11, %v1349_v22  ;;  %v1692_v59 = vclamps-f32 %v1321_v3, 1.0 }
 0xeb3   :  { %1524 = vmatpush.bf16.msra.mxu3 %v1760_v58 }
 0xeb4   :  { %v1351_v25 = vadd.f32 %v1849_v11, %v1350_v23  ;;  %v1364_v30 = vadd.f32 1.0, %v1692_v59 }
 0xeb6   :  { %v1355_v26 = vsel %vm1354_vm5, %v1849_v11, %v1351_v25  ;;  %v1366_v34 = vmul.f32 %v1364_v30, %v1280_v31  ;;  %v1763_v30 = vld [vmem:[%s2420_s18 + $0x8] sm:$0xff]  ;;  %v1790_v31 = vld [vmem:[%s2419_s17] ss:$0 sm:$0xff] }
 0xeb7   :  { %v1360_v28 = vsel %vm1357_vm6, %v1359_v27, %v1355_v26  ;;  %1561 = vmatpush.bf16.msra.mxu0 %v1763_v30 }
 0xeb8   :  { %v1361_v29 = vmul.f32 %v1360_v28, %v1336_v1 }
 0xeba   :  { %v1693_v17 = vclamps-f32 %v1361_v29, 1.0 }
 0xebc   :  { %v1365_v33 = vadd.f32 1.0, %v1693_v17  ;;  %v1762_v17 = vld [vmem:[%s2420_s18] sm:$0xff] }
 0xebd   :  { %1562 = vmatpush.bf16.msra.mxu0 %v1762_v17 }
 0xebe   :  { %v1367_v13 = vmul.f32 %v1365_v33, %v1281_v32 }
 0xec0   :  { %v1377_v35 = vpack.c.bf16 %v1367_v13, %v1366_v34 }
 0xec2   :  { %1719 = vmatmul.msk.bf16.vlgmr.msrb.gmra.mxu2 %vm730_vm4, %v1377_v35 }
 0xf45   :  { %v1419_v53 = vpop.f32.mrf.mxu2 }
 0xf46   :  { %v1420_v36 = vadd.f32 %v1787_v49, %v1419_v53 }
 0xf48   :  { %v1424_v14 = vadd.f32 %v1420_v36, %v2319_v6 }
 0xf4a   :  { %v1430_v38 = vsel %vm73_vm0, %v1424_v14, 0.0 }
 0xf4b   :  { %1431 = vadd.xlane.f32.xlu1 %v1430_v38 }
 0xf4d   :  { %v1421_v8 = vpop.f32.mrf.mxu2 }
 0xf4e   :  { %v1422_v39 = vadd.f32 %v1787_v49, %v1421_v8  ;;  %v1791_v49 = vld [vmem:[%s2421_s19] ss:$0 sm:$0xff] }
 0xf50   :  { %v1425_v21 = vadd.f32 %v1422_v39, %v2321_v7 }
 0xf52   :  { %v1433_v54 = vsel %vm73_vm0, %v1425_v21, 0.0 }
 0xf53   :  { %1434 = vadd.xlane.f32.xlu0 %v1433_v54 }
 0xfbe   :  { %v1432_v40 = vpop.xlane.xlu1 %1431 }
 0xfbf   :  { %v1436_v41 = vmul.f32 %v1432_v40, %v2003_v10 }
 0xfc1   :  { %v1438_v42 = vsub.f32 %v1424_v14, %v1436_v41 }
 0xfc3   :  { %v1440_v44 = vmul.f32 %v1438_v42, %v1438_v42 }
 0xfc5   :  { %v1442_v43 = vsel %vm73_vm0, %v1440_v44, 0.0 }
 0xfc6   :  { %v1435_v37 = vpop.xlane.xlu0 %1434  ;;  %1443 = vadd.xlane.f32.xlu0 %v1442_v43 }
 0xfc7   :  { %v1437_v6 = vmul.f32 %v1435_v37, %v2003_v10 }
 0xfc9   :  { %v1439_v45 = vsub.f32 %v1425_v21, %v1437_v6 }
 0xfcb   :  { %v1441_v47 = vmul.f32 %v1439_v45, %v1439_v45 }
 0xfcd   :  { %v1445_v48 = vsel %vm73_vm0, %v1441_v47, 0.0 }
 0xfce   :  { %1446 = vadd.xlane.f32.xlu2 %v1445_v48 }
0x1039   :  { %v1444_v7 = vpop.xlane.xlu0 %1443 }
0x103a   :  { %v1448_v15 = vmul.f32 %v1444_v7, %v2003_v10 }
0x103c   :  { %v1450_v52 = vadd.f32 1e-12, %v1448_v15 }
0x103e   :  { %1850 = vrsqrt.f32 %v1450_v52  ;;  %vm1458_vm8 = vweird.f32 %v1450_v52 }
0x1041   :  { %v1447_v55 = vpop.xlane.xlu2 %1446 }
0x1042   :  { %v1449_v56 = vmul.f32 %v1447_v55, %v2003_v10 }
0x1044   :  { %v1851_v60 = vpop.eup %1850  ;;  %v1451_v63 = vadd.f32 1e-12, %v1449_v56 }
0x1045   :  { %v1453_v0 = vmul.f32 %v1851_v60, %v1450_v52  ;;  %vm1459_vm4 = vweird.f32 %v1851_v60 }
0x1046   :  { %1852 = vrsqrt.f32 %v1451_v63  ;;  %vm1460_vm9 = vmor %vm1458_vm8, %vm1459_vm4  ;;  %vm1468_vm15 = vweird.f32 %v1451_v63 }
0x1047   :  { %v1454_v62 = vmul.f32 %v1851_v60, %v1453_v0 }
0x1049   :  { %v1455_v57 = vmul.f32 0.5, %v1454_v62 }
0x104b   :  { %v1456_v2 = vsub.f32 1.5, %v1455_v57 }
0x104c   :  { %v1853_v51 = vpop.eup %1852 }
0x104d   :  { %v1457_v61 = vmul.f32 %v1851_v60, %v1456_v2  ;;  %v1463_v5 = vmul.f32 %v1853_v51, %v1451_v63  ;;  %vm1469_vm10 = vweird.f32 %v1853_v51 }
0x104e   :  { %vm1470_vm7 = vmor %vm1468_vm15, %vm1469_vm10 }
0x104f   :  { %v1461_v11 = vsel %vm1460_vm9, %v1851_v60, %v1457_v61  ;;  %v1464_v10 = vmul.f32 %v1853_v51, %v1463_v5 }
0x1050   :  { %v1472_v18 = vmul.f32 %v1461_v11, %v1438_v42 }
0x1051   :  { %v1465_v12 = vmul.f32 0.5, %v1464_v10 }
0x1052   :  { %v1477_v22 = vmul.f32 %v1788_v16, %v1472_v18 }
0x1053   :  { %v1466_v4 = vsub.f32 1.5, %v1465_v12 }
0x1054   :  { %v1482_v3 = vadd.f32 %v1789_v20, %v1477_v22 }
0x1055   :  { %v1467_v46 = vmul.f32 %v1853_v51, %v1466_v4 }
0x1056   :  { %v1488_v25 = vpack.c.bf16 %v1482_v3, %v1482_v3 }
0x1057   :  { %v1471_v19 = vsel %vm1470_vm7, %v1853_v51, %v1467_v46 }
0x1058   :  { %v1473_v50 = vmul.f32 %v1471_v19, %v1439_v45  ;;  %v1496_v1 = vunpack.c.l.b16 %v1488_v25 }
0x105a   :  { %v1478_v23 = vmul.f32 %v1788_v16, %v1473_v50 }
0x105c   :  { %v1483_v24 = vadd.f32 %v1789_v20, %v1478_v23 }
0x105e   :  { %v1489_v27 = vpack.c.bf16 %v1483_v24, %v1483_v24 }
0x1060   :  { %v1497_v59 = vunpack.c.l.b16 %v1489_v27 }
0x1062   :  { %v1498_v26 = vrot.slane %v1497_v59, 7 }
0x1064   :  { %v1500_v28 = vsel %vm1499_vm11, %v1498_v26, %v1496_v1 }
0x1065   :  { %v1501_v29 = vpack.c.b16 %v1500_v28, %v1500_v28 }
0x1067   :  { %1730 = vmatmul.msk.bf16.vlgmr.msra.gmra.mxu3 %vm73_vm0, %v1501_v29 }
0x10ea   :  { %v1526_v32 = vpop.f32.mrf.mxu3 }
0x10eb   :  { %v1527_v33 = vadd.f32 %v1790_v31, %v1526_v32 }
0x10ed   :  { %1854 = vtanh.f32 %v1527_v33 }
0x10f2   :  { %v1528_v34 = vpop.f32.mrf.mxu3 }
0x10f3   :  { %v1855_v13 = vpop.eup %1854 }
0x10f4   :  { %v1535_v35 = vpack.c.bf16 %v1855_v13, %v1855_v13 }
0x10f6   :  { %1739 = vmatmul.msk.bf16.vlgmr.msra.gmra.mxu0 %vm73_vm0, %v1535_v35 }
0x1173   :  { %v1564_v53 = vpop.f32.mrf.mxu0 }
0x1174   :  { %v1565_v36 = vadd.f32 %v1791_v49, %v1564_v53 }
0x1176   :  { %1569 = vst.msk [vmem:[#allocation3] sm:$0x3] %vm1568_vm12, %v1565_v36 }
0x1177   :  { %1580 = dma.vmem_to_hbm [thread:$0]  %s1576_s9, 32, %s1578_s29, [#allocation4]  }
0x117b   :  { %v1566_v14 = vpop.f32.mrf.mxu0 }
0x117c   :  { %1880 = dma.done.wait [#allocation4], 32  }
0x117d   :  { %1881 = vsyncadd [#allocation4], 4294967264 }
0x117e   :  { %1585 = vsyncpa [#allocation4], 1 }

</bundles_post_ra>
